<compile_context>
chip_gen: v6e
topology: v6e:2x2x1
jax: 0.10.0
libtpu: 0.0.40
codegen_flags: <defaults>
</compile_context>

<pallas_src>
import numpy as np
import jax
import jax.numpy as jnp
from jax.experimental import pallas as pl
from jax.experimental.pallas import tpu as pltpu

# Small, self-consistent shapes (PyTorch module used hidden=64, embed=32, 2 layers)
B = 8            # batch (also number of graph nodes)
T = 8            # sequence length
INPUT_SIZE = 16  # per-timestep feature size
HIDDEN = 64
EMBED = 32
NUM_LAYERS = 2


def fraud_gru_kernel(x2d_ref,
                     wih0_ref, whh0_ref, w1_ref,
                     b0_ref, bhn0_ref,
                     brz1_ref, bn1_ref,
                     wfused_ref, bfused_ref,
                     out_ref,
                     gx0_ref):
    H = HIDDEN

    # --- Layer-0 input projections for ALL timesteps in ONE matmul, with the
    # layer-0 input-side biases ([brz0 | bin0]) pre-folded.  Stored to a VMEM
    # scratch so the unrolled recurrence does not pin ~12 vregs. ---
    gx0_ref[...] = (jnp.dot(x2d_ref[...], wih0_ref[...],
                            preferred_element_type=jnp.float32)
                    + b0_ref[...])                               # (T*B, 3H)

    def sig(x):
        # sigmoid via EUP exp + approximate reciprocal (separate VLIW slot,
        # keeps a precise divide off the serial chain).
        return pl.reciprocal(1.0 + jnp.exp(-x), approx=True)

    h0 = jnp.zeros((B, H), jnp.float32)
    h1 = jnp.zeros((B, H), jnp.float32)

    # Fully unrolled: T=8 is a fixed short trip count; unrolling lets the
    # scheduler wavefront layer-0 at t+1 against layer-1 at t.
    for t in range(T):
        # ---- layer 0 cell (the critical serial chain) ----
        gx0 = gx0_ref[pl.ds(t * B, B), :]                        # (B, 3H), biases folded
        gh0 = jnp.dot(h0.astype(jnp.bfloat16), whh0_ref[...],
                      preferred_element_type=jnp.float32)        # (B, 3H)
        rz0 = sig(gx0[:, :2 * H] + gh0[:, :2 * H])               # fused r|z sigmoid
        r0 = rz0[:, :H]
        z0 = rz0[:, H:]
        n0 = jnp.tanh(gx0[:, 2 * H:] + r0 * (gh0[:, 2 * H:] + bhn0_ref[...]))
        h0 = n0 + z0 * (h0 - n0)

        # ---- layer 1 cell: ih1 + hh1 fused into ONE (B,2H)@(2H,4H) matmul ----
        # operand = [h0_t | h1_{t-1}]; output cols = [i_rz+h_rz | i_n | h_n]
        cat = jnp.concatenate([h0, h1], axis=1).astype(jnp.bfloat16)   # (B, 2H)
        g1 = jnp.dot(cat, w1_ref[...],
                     preferred_element_type=jnp.float32)               # (B, 4H)
        rz1 = sig(g1[:, :2 * H] + brz1_ref[...])
        r1 = rz1[:, :H]
        z1 = rz1[:, H:]
        gn1 = g1[:, 2 * H:] + bn1_ref[...]          # [i_n + b_in | h_n + b_hn]
        n1 = jnp.tanh(gn1[:, :H] + r1 * gn1[:, H:])
        h1 = n1 + z1 * (h1 - n1)

    # --- Folded epilogue: fc -> fully-connected GCN with self-loops (== mean
    # over nodes) -> classifier collapses to mean(h1,0).w_fused + b_fused,
    # identical for every node. ---
    h_mean = jnp.mean(h1, axis=0, keepdims=True)                  # (1, H)
    logit = (jnp.sum(h_mean * wfused_ref[...], axis=1, keepdims=True)
             + bfused_ref[...])                                   # (1, 1)
    out_ref[...] = jnp.broadcast_to(logit, (B, 1))


def prepare_kernel_params(p):
    """Derive the kernel's fused / gate-stacked layouts from PyTorch-style params."""
    H = HIDDEN
    kp = {}

    def stack_gates(w3):  # (3, in, H) in (r, z, n) order -> (in, 3H)
        return jnp.concatenate([w3[0], w3[1], w3[2]], axis=1)

    kp["wih0"] = stack_gates(p["w_ih0"]).astype(jnp.bfloat16)   # (INPUT, 3H)
    kp["whh0"] = stack_gates(p["w_hh0"]).astype(jnp.bfloat16)   # (H, 3H)

    # Layer-0 biases folded into gx0_all: [b_r(ih+hh) | b_z(ih+hh) | b_in]
    kp["b0"] = jnp.concatenate([p["b_ih0"][0] + p["b_hh0"][0],
                                p["b_ih0"][1] + p["b_hh0"][1],
                                p["b_ih0"][2]], axis=1).astype(jnp.float32)   # (1, 3H)
    kp["bhn0"] = p["b_hh0"][2].astype(jnp.float32)                            # (1, H)

    # Layer-1 fused weight (2H, 4H): rows [h0-side ; h1-side],
    # cols [ i_rz + h_rz (2H) | i_n (H) | h_n (H) ]  (n-gate sides kept separate
    # because r multiplies only the hidden-side n term in PyTorch GRU).
    zero = jnp.zeros((H, H), jnp.float32)
    w1_top = jnp.concatenate([p["w_ih1"][0], p["w_ih1"][1], p["w_ih1"][2], zero], axis=1)
    w1_bot = jnp.concatenate([p["w_hh1"][0], p["w_hh1"][1], zero, p["w_hh1"][2]], axis=1)
    kp["w1"] = jnp.concatenate([w1_top, w1_bot], axis=0).astype(jnp.bfloat16)   # (2H, 4H)

    kp["brz1"] = jnp.concatenate([p["b_ih1"][0] + p["b_hh1"][0],
                                  p["b_ih1"][1] + p["b_hh1"][1]],
                                 axis=1).astype(jnp.float32)                     # (1, 2H)
    kp["bn1"] = jnp.concatenate([p["b_ih1"][2], p["b_hh1"][2]],
                                axis=1).astype(jnp.float32)                      # (1, 2H)

    # Folded linear epilogue:
    #   logits = mean(h1,0) @ (W_fc W_gcn W_cls) + ((b_fc W_gcn + b_gcn) W_cls + b_cls)
    w_fused = p["w_fc"] @ p["w_gcn"] @ p["w_cls"]                  # (HIDDEN, 1)
    b_fused = (p["b_fc"] @ p["w_gcn"] + p["b_gcn"]) @ p["w_cls"] + p["b_cls"]
    kp["w_fused"] = w_fused.T.astype(jnp.float32)                  # (1, HIDDEN)
    kp["b_fused"] = b_fused.astype(jnp.float32)                    # (1, 1)
    return kp


def fraud_gru_forward(x, kp):
    """x: (B, T, INPUT_SIZE) batch-first, float32. Returns (B, 1) logits."""
    # batch-first -> time-major, then flatten (T, B) so the layer-0 input
    # projection for all timesteps becomes one matmul inside the kernel.
    x2d = (jnp.transpose(x, (1, 0, 2))
           .reshape(T * B, INPUT_SIZE)
           .astype(jnp.bfloat16))
    args = (x2d,
            kp["wih0"], kp["whh0"], kp["w1"],
            kp["b0"], kp["bhn0"],
            kp["brz1"], kp["bn1"],
            kp["w_fused"], kp["b_fused"])
    vmem = pl.BlockSpec(memory_space=pltpu.MemorySpace.VMEM)
    return pl.pallas_call(
        fraud_gru_kernel,
        out_shape=jax.ShapeDtypeStruct((B, 1), jnp.float32),
        in_specs=[vmem] * len(args),
        out_specs=vmem,
        scratch_shapes=[pltpu.VMEM((T * B, 3 * HIDDEN), jnp.float32)],
    )(*args)


def init_params(key):
    """Deterministic synthetic parameters with PyTorch shapes/semantics."""
    ks = list(jax.random.split(key, 20))
    k_iter = iter(ks)

    def unif(shape, scale):
        return jax.random.uniform(next(k_iter), shape, jnp.float32, -scale, scale)

    s = 1.0 / np.sqrt(HIDDEN)
    p = {}
    # GRU layer 0: weight_ih_l0 (3H, INPUT_SIZE), weight_hh_l0 (3H, H), biases (3H,)
    # stored stacked per-gate & transposed: (3, in, H) / (3, 1, H), gate order (r, z, n)
    p["w_ih0"] = unif((3 * HIDDEN, INPUT_SIZE), s).reshape(3, HIDDEN, INPUT_SIZE).transpose(0, 2, 1)
    p["w_hh0"] = unif((3 * HIDDEN, HIDDEN), s).reshape(3, HIDDEN, HIDDEN).transpose(0, 2, 1)
    p["b_ih0"] = unif((3 * HIDDEN,), s).reshape(3, 1, HIDDEN)
    p["b_hh0"] = unif((3 * HIDDEN,), s).reshape(3, 1, HIDDEN)
    # GRU layer 1: input is HIDDEN
    p["w_ih1"] = unif((3 * HIDDEN, HIDDEN), s).reshape(3, HIDDEN, HIDDEN).transpose(0, 2, 1)
    p["w_hh1"] = unif((3 * HIDDEN, HIDDEN), s).reshape(3, HIDDEN, HIDDEN).transpose(0, 2, 1)
    p["b_ih1"] = unif((3 * HIDDEN,), s).reshape(3, 1, HIDDEN)
    p["b_hh1"] = unif((3 * HIDDEN,), s).reshape(3, 1, HIDDEN)
    # fc: Linear(HIDDEN, EMBED) -> stored as (HIDDEN, EMBED)
    sf = 1.0 / np.sqrt(HIDDEN)
    p["w_fc"] = unif((EMBED, HIDDEN), sf).T
    p["b_fc"] = unif((EMBED,), sf).reshape(1, EMBED)
    # gcn: GCNConv(EMBED, EMBED): lin weight (EMBED, EMBED); bias added after aggregation
    sg = 1.0 / np.sqrt(EMBED)
    p["w_gcn"] = unif((EMBED, EMBED), sg).T
    p["b_gcn"] = unif((EMBED,), sg).reshape(1, EMBED)
    # classifier: Linear(EMBED, 1)
    sc = 1.0 / np.sqrt(EMBED)
    p["w_cls"] = unif((1, EMBED), sc).T
    p["b_cls"] = unif((1,), sc).reshape(1, 1)
    return p


def reference_forward(x, p):
    """Pure-JAX f32 reference with the original (unfused) module semantics."""
    def cell(x_t, h_prev, w_ih, w_hh, b_ih, b_hh):
        i_r = x_t @ w_ih[0] + b_ih[0]
        i_z = x_t @ w_ih[1] + b_ih[1]
        i_n = x_t @ w_ih[2] + b_ih[2]
        h_r = h_prev @ w_hh[0] + b_hh[0]
        h_z = h_prev @ w_hh[1] + b_hh[1]
        h_n = h_prev @ w_hh[2] + b_hh[2]
        r = jax.nn.sigmoid(i_r + h_r)
        z = jax.nn.sigmoid(i_z + h_z)
        n = jnp.tanh(i_n + r * h_n)
        return (1.0 - z) * n + z * h_prev

    h0 = jnp.zeros((B, HIDDEN), jnp.float32)
    h1 = jnp.zeros((B, HIDDEN), jnp.float32)
    for t in range(T):
        x_t = x[:, t, :]
        h0 = cell(x_t, h0, p["w_ih0"], p["w_hh0"], p["b_ih0"], p["b_hh0"])
        h1 = cell(h0, h1, p["w_ih1"], p["w_hh1"], p["b_ih1"], p["b_hh1"])
    embedding = h1 @ p["w_fc"] + p["b_fc"]
    transformed = embedding @ p["w_gcn"]
    gcn = jnp.broadcast_to(jnp.mean(transformed, axis=0, keepdims=True), (B, EMBED)) + p["b_gcn"]
    return gcn @ p["w_cls"] + p["b_cls"]


if __name__ == "__main__":
    key = jax.random.PRNGKey(0)
    kx, kp_key = jax.random.split(key)
    x = jax.random.normal(kx, (B, T, INPUT_SIZE), dtype=jnp.float32)
    params = init_params(kp_key)
    kparams = prepare_kernel_params(params)

    logits = fraud_gru_forward(x, kparams)
    jax.block_until_ready(logits)

    ref = reference_forward(x, params)
    # bf16 matmul operands (f32 accumulate) + the approximate-reciprocal sigmoid
    # perturb numerics vs the pure-f32 reference through the T=8 recurrence.
    np.testing.assert_allclose(np.asarray(logits), np.asarray(ref),
                               rtol=2e-2, atol=2e-2)
    assert logits.shape == (B, 1)
    print("KERNEL_OK")
</pallas_src>

<mosaic_0001>
module attributes {stable_mosaic.version = 11 : i64} {
  func.func @fraud_gru_kernel(%arg0: memref<64x16xbf16, #tpu.memory_space<vmem>>, %arg1: memref<16x192xbf16, #tpu.memory_space<vmem>>, %arg2: memref<64x192xbf16, #tpu.memory_space<vmem>>, %arg3: memref<128x256xbf16, #tpu.memory_space<vmem>>, %arg4: memref<1x192xf32, #tpu.memory_space<vmem>>, %arg5: memref<1x64xf32, #tpu.memory_space<vmem>>, %arg6: memref<1x128xf32, #tpu.memory_space<vmem>>, %arg7: memref<1x128xf32, #tpu.memory_space<vmem>>, %arg8: memref<1x64xf32, #tpu.memory_space<vmem>>, %arg9: memref<1x1xf32, #tpu.memory_space<vmem>>, %arg10: memref<8x1xf32, #tpu.memory_space<vmem>>, %arg11: memref<64x192xf32, #tpu.memory_space<vmem>>) attributes {dimension_semantics = [], scalar_prefetch = 0 : i64, scratch_operands = 1 : i64, tpu.core_type = #tpu.core_type<tc>} {
    %c0 = arith.constant 0 : index
    %c0_0 = arith.constant 0 : index
    %0 = vector.load %arg0[%c0, %c0_0] : memref<64x16xbf16, #tpu.memory_space<vmem>>, vector<64x16xbf16>
    %c0_1 = arith.constant 0 : index
    %c0_2 = arith.constant 0 : index
    %1 = vector.load %arg1[%c0_1, %c0_2] : memref<16x192xbf16, #tpu.memory_space<vmem>>, vector<16x192xbf16>
    %cst = arith.constant dense<0.000000e+00> : vector<64x192xf32>
    %2 = tpu.matmul %0, %1, %cst {dimension_numbers = #tpu.dot_dimension_numbers<[1], [0], [0], [1], [0, 0, 1, 1], [], []>} : vector<64x16xbf16>, vector<16x192xbf16>, vector<64x192xf32> -> vector<64x192xf32>
    %c0_3 = arith.constant 0 : index
    %c0_4 = arith.constant 0 : index
    %3 = vector.load %arg4[%c0_3, %c0_4] : memref<1x192xf32, #tpu.memory_space<vmem>>, vector<1x192xf32>
    %4 = vector.broadcast %3 : vector<1x192xf32> to vector<64x192xf32>
    %5 = arith.addf %2, %4 : vector<64x192xf32>
    %c0_5 = arith.constant 0 : index
    %c0_6 = arith.constant 0 : index
    %6 = vector.load %arg11[%c0_5, %c0_6] : memref<64x192xf32, #tpu.memory_space<vmem>>, vector<64x192xf32>
    tpu.vector_store %arg11[%c0_5, %c0_6], %5 {strides = array<i32>} : memref<64x192xf32, #tpu.memory_space<vmem>>, vector<64x192xf32>,
    %cst_7 = arith.constant 0.000000e+00 : f32
    %7 = vector.broadcast %cst_7 : f32 to vector<8x64xf32>
    %cst_8 = arith.constant 0.000000e+00 : f32
    %8 = vector.broadcast %cst_8 : f32 to vector<8x64xf32>
    %c0_9 = arith.constant 0 : index
    %c0_10 = arith.constant 0 : index
    %9 = vector.load %arg11[%c0_9, %c0_10] : memref<64x192xf32, #tpu.memory_space<vmem>>, vector<8x192xf32>
    %10 = arith.truncf %7 : vector<8x64xf32> to vector<8x64xbf16>
    %c0_11 = arith.constant 0 : index
    %c0_12 = arith.constant 0 : index
    %11 = vector.load %arg2[%c0_11, %c0_12] : memref<64x192xbf16, #tpu.memory_space<vmem>>, vector<64x192xbf16>
    %cst_13 = arith.constant dense<0.000000e+00> : vector<8x192xf32>
    %12 = tpu.matmul %10, %11, %cst_13 {dimension_numbers = #tpu.dot_dimension_numbers<[1], [0], [0], [1], [0, 0, 1, 1], [], []>} : vector<8x64xbf16>, vector<64x192xbf16>, vector<8x192xf32> -> vector<8x192xf32>
    %13 = vector.extract_strided_slice %9 {offsets = [0, 0], sizes = [8, 128], strides = [1, 1]} : vector<8x192xf32> to vector<8x128xf32>
    %14 = vector.extract_strided_slice %12 {offsets = [0, 0], sizes = [8, 128], strides = [1, 1]} : vector<8x192xf32> to vector<8x128xf32>
    %15 = arith.addf %13, %14 : vector<8x128xf32>
    %cst_14 = arith.constant 0.000000e+00 : f32
    %16 = vector.broadcast %cst_14 : f32 to vector<8x128xf32>
    %17 = arith.subf %16, %15 : vector<8x128xf32>
    %18 = math.exp %17 : vector<8x128xf32>
    %cst_15 = arith.constant 1.000000e+00 : f32
    %19 = vector.broadcast %cst_15 : f32 to vector<8x128xf32>
    %20 = arith.addf %19, %18 : vector<8x128xf32>
    %21 = tpu.reciprocal %20 {approx = true} : vector<8x128xf32> -> vector<8x128xf32>
    %22 = vector.extract_strided_slice %21 {offsets = [0, 0], sizes = [8, 64], strides = [1, 1]} : vector<8x128xf32> to vector<8x64xf32>
    %23 = vector.extract_strided_slice %21 {offsets = [0, 64], sizes = [8, 64], strides = [1, 1]} : vector<8x128xf32> to vector<8x64xf32>
    %24 = vector.extract_strided_slice %9 {offsets = [0, 128], sizes = [8, 64], strides = [1, 1]} : vector<8x192xf32> to vector<8x64xf32>
    %25 = vector.extract_strided_slice %12 {offsets = [0, 128], sizes = [8, 64], strides = [1, 1]} : vector<8x192xf32> to vector<8x64xf32>
    %c0_16 = arith.constant 0 : index
    %c0_17 = arith.constant 0 : index
    %26 = vector.load %arg5[%c0_16, %c0_17] : memref<1x64xf32, #tpu.memory_space<vmem>>, vector<1x64xf32>
    %27 = vector.broadcast %26 : vector<1x64xf32> to vector<8x64xf32>
    %28 = arith.addf %25, %27 : vector<8x64xf32>
    %29 = arith.mulf %22, %28 : vector<8x64xf32>
    %30 = arith.addf %24, %29 : vector<8x64xf32>
    %31 = math.tanh %30 : vector<8x64xf32>
    %32 = arith.subf %7, %31 : vector<8x64xf32>
    %33 = arith.mulf %23, %32 : vector<8x64xf32>
    %34 = arith.addf %31, %33 : vector<8x64xf32>
    %35 = tpu.concatenate %34, %8 in 1 : vector<8x64xf32>, vector<8x64xf32> -> vector<8x128xf32>
    %36 = arith.truncf %35 : vector<8x128xf32> to vector<8x128xbf16>
    %c0_18 = arith.constant 0 : index
    %c0_19 = arith.constant 0 : index
    %37 = vector.load %arg3[%c0_18, %c0_19] : memref<128x256xbf16, #tpu.memory_space<vmem>>, vector<128x256xbf16>
    %cst_20 = arith.constant dense<0.000000e+00> : vector<8x256xf32>
    %38 = tpu.matmul %36, %37, %cst_20 {dimension_numbers = #tpu.dot_dimension_numbers<[1], [0], [0], [1], [0, 0, 1, 1], [], []>} : vector<8x128xbf16>, vector<128x256xbf16>, vector<8x256xf32> -> vector<8x256xf32>
    %39 = vector.extract_strided_slice %38 {offsets = [0, 0], sizes = [8, 128], strides = [1, 1]} : vector<8x256xf32> to vector<8x128xf32>
    %c0_21 = arith.constant 0 : index
    %c0_22 = arith.constant 0 : index
    %40 = vector.load %arg6[%c0_21, %c0_22] : memref<1x128xf32, #tpu.memory_space<vmem>>, vector<1x128xf32>
    %41 = vector.broadcast %40 : vector<1x128xf32> to vector<8x128xf32>
    %42 = arith.addf %39, %41 : vector<8x128xf32>
    %cst_23 = arith.constant 0.000000e+00 : f32
    %43 = vector.broadcast %cst_23 : f32 to vector<8x128xf32>
    %44 = arith.subf %43, %42 : vector<8x128xf32>
    %45 = math.exp %44 : vector<8x128xf32>
    %cst_24 = arith.constant 1.000000e+00 : f32
    %46 = vector.broadcast %cst_24 : f32 to vector<8x128xf32>
    %47 = arith.addf %46, %45 : vector<8x128xf32>
    %48 = tpu.reciprocal %47 {approx = true} : vector<8x128xf32> -> vector<8x128xf32>
    %49 = vector.extract_strided_slice %48 {offsets = [0, 0], sizes = [8, 64], strides = [1, 1]} : vector<8x128xf32> to vector<8x64xf32>
    %50 = vector.extract_strided_slice %48 {offsets = [0, 64], sizes = [8, 64], strides = [1, 1]} : vector<8x128xf32> to vector<8x64xf32>
    %51 = vector.extract_strided_slice %38 {offsets = [0, 128], sizes = [8, 128], strides = [1, 1]} : vector<8x256xf32> to vector<8x128xf32>
    %c0_25 = arith.constant 0 : index
    %c0_26 = arith.constant 0 : index
    %52 = vector.load %arg7[%c0_25, %c0_26] : memref<1x128xf32, #tpu.memory_space<vmem>>, vector<1x128xf32>
    %53 = vector.broadcast %52 : vector<1x128xf32> to vector<8x128xf32>
    %54 = arith.addf %51, %53 : vector<8x128xf32>
    %55 = vector.extract_strided_slice %54 {offsets = [0, 0], sizes = [8, 64], strides = [1, 1]} : vector<8x128xf32> to vector<8x64xf32>
    %56 = vector.extract_strided_slice %54 {offsets = [0, 64], sizes = [8, 64], strides = [1, 1]} : vector<8x128xf32> to vector<8x64xf32>
    %57 = arith.mulf %49, %56 : vector<8x64xf32>
    %58 = arith.addf %55, %57 : vector<8x64xf32>
    %59 = math.tanh %58 : vector<8x64xf32>
    %60 = arith.subf %8, %59 : vector<8x64xf32>
    %61 = arith.mulf %50, %60 : vector<8x64xf32>
    %62 = arith.addf %59, %61 : vector<8x64xf32>
    %c8 = arith.constant 8 : index
    %c0_27 = arith.constant 0 : index
    %63 = vector.load %arg11[%c8, %c0_27] : memref<64x192xf32, #tpu.memory_space<vmem>>, vector<8x192xf32>
    %64 = arith.truncf %34 : vector<8x64xf32> to vector<8x64xbf16>
    %c0_28 = arith.constant 0 : index
    %c0_29 = arith.constant 0 : index
    %65 = vector.load %arg2[%c0_28, %c0_29] : memref<64x192xbf16, #tpu.memory_space<vmem>>, vector<64x192xbf16>
    %cst_30 = arith.constant dense<0.000000e+00> : vector<8x192xf32>
    %66 = tpu.matmul %64, %65, %cst_30 {dimension_numbers = #tpu.dot_dimension_numbers<[1], [0], [0], [1], [0, 0, 1, 1], [], []>} : vector<8x64xbf16>, vector<64x192xbf16>, vector<8x192xf32> -> vector<8x192xf32>
    %67 = vector.extract_strided_slice %63 {offsets = [0, 0], sizes = [8, 128], strides = [1, 1]} : vector<8x192xf32> to vector<8x128xf32>
    %68 = vector.extract_strided_slice %66 {offsets = [0, 0], sizes = [8, 128], strides = [1, 1]} : vector<8x192xf32> to vector<8x128xf32>
    %69 = arith.addf %67, %68 : vector<8x128xf32>
    %cst_31 = arith.constant 0.000000e+00 : f32
    %70 = vector.broadcast %cst_31 : f32 to vector<8x128xf32>
    %71 = arith.subf %70, %69 : vector<8x128xf32>
    %72 = math.exp %71 : vector<8x128xf32>
    %cst_32 = arith.constant 1.000000e+00 : f32
    %73 = vector.broadcast %cst_32 : f32 to vector<8x128xf32>
    %74 = arith.addf %73, %72 : vector<8x128xf32>
    %75 = tpu.reciprocal %74 {approx = true} : vector<8x128xf32> -> vector<8x128xf32>
    %76 = vector.extract_strided_slice %75 {offsets = [0, 0], sizes = [8, 64], strides = [1, 1]} : vector<8x128xf32> to vector<8x64xf32>
    %77 = vector.extract_strided_slice %75 {offsets = [0, 64], sizes = [8, 64], strides = [1, 1]} : vector<8x128xf32> to vector<8x64xf32>
    %78 = vector.extract_strided_slice %63 {offsets = [0, 128], sizes = [8, 64], strides = [1, 1]} : vector<8x192xf32> to vector<8x64xf32>
    %79 = vector.extract_strided_slice %66 {offsets = [0, 128], sizes = [8, 64], strides = [1, 1]} : vector<8x192xf32> to vector<8x64xf32>
    %c0_33 = arith.constant 0 : index
    %c0_34 = arith.constant 0 : index
    %80 = vector.load %arg5[%c0_33, %c0_34] : memref<1x64xf32, #tpu.memory_space<vmem>>, vector<1x64xf32>
    %81 = vector.broadcast %80 : vector<1x64xf32> to vector<8x64xf32>
    %82 = arith.addf %79, %81 : vector<8x64xf32>
    %83 = arith.mulf %76, %82 : vector<8x64xf32>
    %84 = arith.addf %78, %83 : vector<8x64xf32>
    %85 = math.tanh %84 : vector<8x64xf32>
    %86 = arith.subf %34, %85 : vector<8x64xf32>
    %87 = arith.mulf %77, %86 : vector<8x64xf32>
    %88 = arith.addf %85, %87 : vector<8x64xf32>
    %89 = tpu.concatenate %88, %62 in 1 : vector<8x64xf32>, vector<8x64xf32> -> vector<8x128xf32>
    %90 = arith.truncf %89 : vector<8x128xf32> to vector<8x128xbf16>
    %c0_35 = arith.constant 0 : index
    %c0_36 = arith.constant 0 : index
    %91 = vector.load %arg3[%c0_35, %c0_36] : memref<128x256xbf16, #tpu.memory_space<vmem>>, vector<128x256xbf16>
    %cst_37 = arith.constant dense<0.000000e+00> : vector<8x256xf32>
    %92 = tpu.matmul %90, %91, %cst_37 {dimension_numbers = #tpu.dot_dimension_numbers<[1], [0], [0], [1], [0, 0, 1, 1], [], []>} : vector<8x128xbf16>, vector<128x256xbf16>, vector<8x256xf32> -> vector<8x256xf32>
    %93 = vector.extract_strided_slice %92 {offsets = [0, 0], sizes = [8, 128], strides = [1, 1]} : vector<8x256xf32> to vector<8x128xf32>
    %c0_38 = arith.constant 0 : index
    %c0_39 = arith.constant 0 : index
    %94 = vector.load %arg6[%c0_38, %c0_39] : memref<1x128xf32, #tpu.memory_space<vmem>>, vector<1x128xf32>
    %95 = vector.broadcast %94 : vector<1x128xf32> to vector<8x128xf32>
    %96 = arith.addf %93, %95 : vector<8x128xf32>
    %cst_40 = arith.constant 0.000000e+00 : f32
    %97 = vector.broadcast %cst_40 : f32 to vector<8x128xf32>
    %98 = arith.subf %97, %96 : vector<8x128xf32>
    %99 = math.exp %98 : vector<8x128xf32>
    %cst_41 = arith.constant 1.000000e+00 : f32
    %100 = vector.broadcast %cst_41 : f32 to vector<8x128xf32>
    %101 = arith.addf %100, %99 : vector<8x128xf32>
    %102 = tpu.reciprocal %101 {approx = true} : vector<8x128xf32> -> vector<8x128xf32>
    %103 = vector.extract_strided_slice %102 {offsets = [0, 0], sizes = [8, 64], strides = [1, 1]} : vector<8x128xf32> to vector<8x64xf32>
    %104 = vector.extract_strided_slice %102 {offsets = [0, 64], sizes = [8, 64], strides = [1, 1]} : vector<8x128xf32> to vector<8x64xf32>
    %105 = vector.extract_strided_slice %92 {offsets = [0, 128], sizes = [8, 128], strides = [1, 1]} : vector<8x256xf32> to vector<8x128xf32>
    %c0_42 = arith.constant 0 : index
    %c0_43 = arith.constant 0 : index
    %106 = vector.load %arg7[%c0_42, %c0_43] : memref<1x128xf32, #tpu.memory_space<vmem>>, vector<1x128xf32>
    %107 = vector.broadcast %106 : vector<1x128xf32> to vector<8x128xf32>
    %108 = arith.addf %105, %107 : vector<8x128xf32>
    %109 = vector.extract_strided_slice %108 {offsets = [0, 0], sizes = [8, 64], strides = [1, 1]} : vector<8x128xf32> to vector<8x64xf32>
    %110 = vector.extract_strided_slice %108 {offsets = [0, 64], sizes = [8, 64], strides = [1, 1]} : vector<8x128xf32> to vector<8x64xf32>
    %111 = arith.mulf %103, %110 : vector<8x64xf32>
    %112 = arith.addf %109, %111 : vector<8x64xf32>
    %113 = math.tanh %112 : vector<8x64xf32>
    %114 = arith.subf %62, %113 : vector<8x64xf32>
    %115 = arith.mulf %104, %114 : vector<8x64xf32>
    %116 = arith.addf %113, %115 : vector<8x64xf32>
    %c16 = arith.constant 16 : index
    %c0_44 = arith.constant 0 : index
    %117 = vector.load %arg11[%c16, %c0_44] : memref<64x192xf32, #tpu.memory_space<vmem>>, vector<8x192xf32>
    %118 = arith.truncf %88 : vector<8x64xf32> to vector<8x64xbf16>
    %c0_45 = arith.constant 0 : index
    %c0_46 = arith.constant 0 : index
    %119 = vector.load %arg2[%c0_45, %c0_46] : memref<64x192xbf16, #tpu.memory_space<vmem>>, vector<64x192xbf16>
    %cst_47 = arith.constant dense<0.000000e+00> : vector<8x192xf32>
    %120 = tpu.matmul %118, %119, %cst_47 {dimension_numbers = #tpu.dot_dimension_numbers<[1], [0], [0], [1], [0, 0, 1, 1], [], []>} : vector<8x64xbf16>, vector<64x192xbf16>, vector<8x192xf32> -> vector<8x192xf32>
    %121 = vector.extract_strided_slice %117 {offsets = [0, 0], sizes = [8, 128], strides = [1, 1]} : vector<8x192xf32> to vector<8x128xf32>
    %122 = vector.extract_strided_slice %120 {offsets = [0, 0], sizes = [8, 128], strides = [1, 1]} : vector<8x192xf32> to vector<8x128xf32>
    %123 = arith.addf %121, %122 : vector<8x128xf32>
    %cst_48 = arith.constant 0.000000e+00 : f32
    %124 = vector.broadcast %cst_48 : f32 to vector<8x128xf32>
    %125 = arith.subf %124, %123 : vector<8x128xf32>
    %126 = math.exp %125 : vector<8x128xf32>
    %cst_49 = arith.constant 1.000000e+00 : f32
    %127 = vector.broadcast %cst_49 : f32 to vector<8x128xf32>
    %128 = arith.addf %127, %126 : vector<8x128xf32>
    %129 = tpu.reciprocal %128 {approx = true} : vector<8x128xf32> -> vector<8x128xf32>
    %130 = vector.extract_strided_slice %129 {offsets = [0, 0], sizes = [8, 64], strides = [1, 1]} : vector<8x128xf32> to vector<8x64xf32>
    %131 = vector.extract_strided_slice %129 {offsets = [0, 64], sizes = [8, 64], strides = [1, 1]} : vector<8x128xf32> to vector<8x64xf32>
    %132 = vector.extract_strided_slice %117 {offsets = [0, 128], sizes = [8, 64], strides = [1, 1]} : vector<8x192xf32> to vector<8x64xf32>
    %133 = vector.extract_strided_slice %120 {offsets = [0, 128], sizes = [8, 64], strides = [1, 1]} : vector<8x192xf32> to vector<8x64xf32>
    %c0_50 = arith.constant 0 : index
    %c0_51 = arith.constant 0 : index
    %134 = vector.load %arg5[%c0_50, %c0_51] : memref<1x64xf32, #tpu.memory_space<vmem>>, vector<1x64xf32>
    %135 = vector.broadcast %134 : vector<1x64xf32> to vector<8x64xf32>
    %136 = arith.addf %133, %135 : vector<8x64xf32>
    %137 = arith.mulf %130, %136 : vector<8x64xf32>
    %138 = arith.addf %132, %137 : vector<8x64xf32>
    %139 = math.tanh %138 : vector<8x64xf32>
    %140 = arith.subf %88, %139 : vector<8x64xf32>
    %141 = arith.mulf %131, %140 : vector<8x64xf32>
    %142 = arith.addf %139, %141 : vector<8x64xf32>
    %143 = tpu.concatenate %142, %116 in 1 : vector<8x64xf32>, vector<8x64xf32> -> vector<8x128xf32>
    %144 = arith.truncf %143 : vector<8x128xf32> to vector<8x128xbf16>
    %c0_52 = arith.constant 0 : index
    %c0_53 = arith.constant 0 : index
    %145 = vector.load %arg3[%c0_52, %c0_53] : memref<128x256xbf16, #tpu.memory_space<vmem>>, vector<128x256xbf16>
    %cst_54 = arith.constant dense<0.000000e+00> : vector<8x256xf32>
    %146 = tpu.matmul %144, %145, %cst_54 {dimension_numbers = #tpu.dot_dimension_numbers<[1], [0], [0], [1], [0, 0, 1, 1], [], []>} : vector<8x128xbf16>, vector<128x256xbf16>, vector<8x256xf32> -> vector<8x256xf32>
    %147 = vector.extract_strided_slice %146 {offsets = [0, 0], sizes = [8, 128], strides = [1, 1]} : vector<8x256xf32> to vector<8x128xf32>
    %c0_55 = arith.constant 0 : index
    %c0_56 = arith.constant 0 : index
    %148 = vector.load %arg6[%c0_55, %c0_56] : memref<1x128xf32, #tpu.memory_space<vmem>>, vector<1x128xf32>
    %149 = vector.broadcast %148 : vector<1x128xf32> to vector<8x128xf32>
    %150 = arith.addf %147, %149 : vector<8x128xf32>
    %cst_57 = arith.constant 0.000000e+00 : f32
    %151 = vector.broadcast %cst_57 : f32 to vector<8x128xf32>
    %152 = arith.subf %151, %150 : vector<8x128xf32>
    %153 = math.exp %152 : vector<8x128xf32>
    %cst_58 = arith.constant 1.000000e+00 : f32
    %154 = vector.broadcast %cst_58 : f32 to vector<8x128xf32>
    %155 = arith.addf %154, %153 : vector<8x128xf32>
    %156 = tpu.reciprocal %155 {approx = true} : vector<8x128xf32> -> vector<8x128xf32>
    %157 = vector.extract_strided_slice %156 {offsets = [0, 0], sizes = [8, 64], strides = [1, 1]} : vector<8x128xf32> to vector<8x64xf32>
    %158 = vector.extract_strided_slice %156 {offsets = [0, 64], sizes = [8, 64], strides = [1, 1]} : vector<8x128xf32> to vector<8x64xf32>
    %159 = vector.extract_strided_slice %146 {offsets = [0, 128], sizes = [8, 128], strides = [1, 1]} : vector<8x256xf32> to vector<8x128xf32>
    %c0_59 = arith.constant 0 : index
    %c0_60 = arith.constant 0 : index
    %160 = vector.load %arg7[%c0_59, %c0_60] : memref<1x128xf32, #tpu.memory_space<vmem>>, vector<1x128xf32>
    %161 = vector.broadcast %160 : vector<1x128xf32> to vector<8x128xf32>
    %162 = arith.addf %159, %161 : vector<8x128xf32>
    %163 = vector.extract_strided_slice %162 {offsets = [0, 0], sizes = [8, 64], strides = [1, 1]} : vector<8x128xf32> to vector<8x64xf32>
    %164 = vector.extract_strided_slice %162 {offsets = [0, 64], sizes = [8, 64], strides = [1, 1]} : vector<8x128xf32> to vector<8x64xf32>
    %165 = arith.mulf %157, %164 : vector<8x64xf32>
    %166 = arith.addf %163, %165 : vector<8x64xf32>
    %167 = math.tanh %166 : vector<8x64xf32>
    %168 = arith.subf %116, %167 : vector<8x64xf32>
    %169 = arith.mulf %158, %168 : vector<8x64xf32>
    %170 = arith.addf %167, %169 : vector<8x64xf32>
    %c24 = arith.constant 24 : index
    %c0_61 = arith.constant 0 : index
    %171 = vector.load %arg11[%c24, %c0_61] : memref<64x192xf32, #tpu.memory_space<vmem>>, vector<8x192xf32>
    %172 = arith.truncf %142 : vector<8x64xf32> to vector<8x64xbf16>
    %c0_62 = arith.constant 0 : index
    %c0_63 = arith.constant 0 : index
    %173 = vector.load %arg2[%c0_62, %c0_63] : memref<64x192xbf16, #tpu.memory_space<vmem>>, vector<64x192xbf16>
    %cst_64 = arith.constant dense<0.000000e+00> : vector<8x192xf32>
    %174 = tpu.matmul %172, %173, %cst_64 {dimension_numbers = #tpu.dot_dimension_numbers<[1], [0], [0], [1], [0, 0, 1, 1], [], []>} : vector<8x64xbf16>, vector<64x192xbf16>, vector<8x192xf32> -> vector<8x192xf32>
    %175 = vector.extract_strided_slice %171 {offsets = [0, 0], sizes = [8, 128], strides = [1, 1]} : vector<8x192xf32> to vector<8x128xf32>
    %176 = vector.extract_strided_slice %174 {offsets = [0, 0], sizes = [8, 128], strides = [1, 1]} : vector<8x192xf32> to vector<8x128xf32>
    %177 = arith.addf %175, %176 : vector<8x128xf32>
    %cst_65 = arith.constant 0.000000e+00 : f32
    %178 = vector.broadcast %cst_65 : f32 to vector<8x128xf32>
    %179 = arith.subf %178, %177 : vector<8x128xf32>
    %180 = math.exp %179 : vector<8x128xf32>
    %cst_66 = arith.constant 1.000000e+00 : f32
    %181 = vector.broadcast %cst_66 : f32 to vector<8x128xf32>
    %182 = arith.addf %181, %180 : vector<8x128xf32>
    %183 = tpu.reciprocal %182 {approx = true} : vector<8x128xf32> -> vector<8x128xf32>
    %184 = vector.extract_strided_slice %183 {offsets = [0, 0], sizes = [8, 64], strides = [1, 1]} : vector<8x128xf32> to vector<8x64xf32>
    %185 = vector.extract_strided_slice %183 {offsets = [0, 64], sizes = [8, 64], strides = [1, 1]} : vector<8x128xf32> to vector<8x64xf32>
    %186 = vector.extract_strided_slice %171 {offsets = [0, 128], sizes = [8, 64], strides = [1, 1]} : vector<8x192xf32> to vector<8x64xf32>
    %187 = vector.extract_strided_slice %174 {offsets = [0, 128], sizes = [8, 64], strides = [1, 1]} : vector<8x192xf32> to vector<8x64xf32>
    %c0_67 = arith.constant 0 : index
    %c0_68 = arith.constant 0 : index
    %188 = vector.load %arg5[%c0_67, %c0_68] : memref<1x64xf32, #tpu.memory_space<vmem>>, vector<1x64xf32>
    %189 = vector.broadcast %188 : vector<1x64xf32> to vector<8x64xf32>
    %190 = arith.addf %187, %189 : vector<8x64xf32>
    %191 = arith.mulf %184, %190 : vector<8x64xf32>
    %192 = arith.addf %186, %191 : vector<8x64xf32>
    %193 = math.tanh %192 : vector<8x64xf32>
    %194 = arith.subf %142, %193 : vector<8x64xf32>
    %195 = arith.mulf %185, %194 : vector<8x64xf32>
    %196 = arith.addf %193, %195 : vector<8x64xf32>
    %197 = tpu.concatenate %196, %170 in 1 : vector<8x64xf32>, vector<8x64xf32> -> vector<8x128xf32>
    %198 = arith.truncf %197 : vector<8x128xf32> to vector<8x128xbf16>
    %c0_69 = arith.constant 0 : index
    %c0_70 = arith.constant 0 : index
    %199 = vector.load %arg3[%c0_69, %c0_70] : memref<128x256xbf16, #tpu.memory_space<vmem>>, vector<128x256xbf16>
    %cst_71 = arith.constant dense<0.000000e+00> : vector<8x256xf32>
    %200 = tpu.matmul %198, %199, %cst_71 {dimension_numbers = #tpu.dot_dimension_numbers<[1], [0], [0], [1], [0, 0, 1, 1], [], []>} : vector<8x128xbf16>, vector<128x256xbf16>, vector<8x256xf32> -> vector<8x256xf32>
    %201 = vector.extract_strided_slice %200 {offsets = [0, 0], sizes = [8, 128], strides = [1, 1]} : vector<8x256xf32> to vector<8x128xf32>
    %c0_72 = arith.constant 0 : index
    %c0_73 = arith.constant 0 : index
    %202 = vector.load %arg6[%c0_72, %c0_73] : memref<1x128xf32, #tpu.memory_space<vmem>>, vector<1x128xf32>
    %203 = vector.broadcast %202 : vector<1x128xf32> to vector<8x128xf32>
    %204 = arith.addf %201, %203 : vector<8x128xf32>
    %cst_74 = arith.constant 0.000000e+00 : f32
    %205 = vector.broadcast %cst_74 : f32 to vector<8x128xf32>
    %206 = arith.subf %205, %204 : vector<8x128xf32>
    %207 = math.exp %206 : vector<8x128xf32>
    %cst_75 = arith.constant 1.000000e+00 : f32
    %208 = vector.broadcast %cst_75 : f32 to vector<8x128xf32>
    %209 = arith.addf %208, %207 : vector<8x128xf32>
    %210 = tpu.reciprocal %209 {approx = true} : vector<8x128xf32> -> vector<8x128xf32>
    %211 = vector.extract_strided_slice %210 {offsets = [0, 0], sizes = [8, 64], strides = [1, 1]} : vector<8x128xf32> to vector<8x64xf32>
    %212 = vector.extract_strided_slice %210 {offsets = [0, 64], sizes = [8, 64], strides = [1, 1]} : vector<8x128xf32> to vector<8x64xf32>
    %213 = vector.extract_strided_slice %200 {offsets = [0, 128], sizes = [8, 128], strides = [1, 1]} : vector<8x256xf32> to vector<8x128xf32>
    %c0_76 = arith.constant 0 : index
    %c0_77 = arith.constant 0 : index
    %214 = vector.load %arg7[%c0_76, %c0_77] : memref<1x128xf32, #tpu.memory_space<vmem>>, vector<1x128xf32>
    %215 = vector.broadcast %214 : vector<1x128xf32> to vector<8x128xf32>
    %216 = arith.addf %213, %215 : vector<8x128xf32>
    %217 = vector.extract_strided_slice %216 {offsets = [0, 0], sizes = [8, 64], strides = [1, 1]} : vector<8x128xf32> to vector<8x64xf32>
    %218 = vector.extract_strided_slice %216 {offsets = [0, 64], sizes = [8, 64], strides = [1, 1]} : vector<8x128xf32> to vector<8x64xf32>
    %219 = arith.mulf %211, %218 : vector<8x64xf32>
    %220 = arith.addf %217, %219 : vector<8x64xf32>
    %221 = math.tanh %220 : vector<8x64xf32>
    %222 = arith.subf %170, %221 : vector<8x64xf32>
    %223 = arith.mulf %212, %222 : vector<8x64xf32>
    %224 = arith.addf %221, %223 : vector<8x64xf32>
    %c32 = arith.constant 32 : index
    %c0_78 = arith.constant 0 : index
    %225 = vector.load %arg11[%c32, %c0_78] : memref<64x192xf32, #tpu.memory_space<vmem>>, vector<8x192xf32>
    %226 = arith.truncf %196 : vector<8x64xf32> to vector<8x64xbf16>
    %c0_79 = arith.constant 0 : index
    %c0_80 = arith.constant 0 : index
    %227 = vector.load %arg2[%c0_79, %c0_80] : memref<64x192xbf16, #tpu.memory_space<vmem>>, vector<64x192xbf16>
    %cst_81 = arith.constant dense<0.000000e+00> : vector<8x192xf32>
    %228 = tpu.matmul %226, %227, %cst_81 {dimension_numbers = #tpu.dot_dimension_numbers<[1], [0], [0], [1], [0, 0, 1, 1], [], []>} : vector<8x64xbf16>, vector<64x192xbf16>, vector<8x192xf32> -> vector<8x192xf32>
    %229 = vector.extract_strided_slice %225 {offsets = [0, 0], sizes = [8, 128], strides = [1, 1]} : vector<8x192xf32> to vector<8x128xf32>
    %230 = vector.extract_strided_slice %228 {offsets = [0, 0], sizes = [8, 128], strides = [1, 1]} : vector<8x192xf32> to vector<8x128xf32>
    %231 = arith.addf %229, %230 : vector<8x128xf32>
    %cst_82 = arith.constant 0.000000e+00 : f32
    %232 = vector.broadcast %cst_82 : f32 to vector<8x128xf32>
    %233 = arith.subf %232, %231 : vector<8x128xf32>
    %234 = math.exp %233 : vector<8x128xf32>
    %cst_83 = arith.constant 1.000000e+00 : f32
    %235 = vector.broadcast %cst_83 : f32 to vector<8x128xf32>
    %236 = arith.addf %235, %234 : vector<8x128xf32>
    %237 = tpu.reciprocal %236 {approx = true} : vector<8x128xf32> -> vector<8x128xf32>
    %238 = vector.extract_strided_slice %237 {offsets = [0, 0], sizes = [8, 64], strides = [1, 1]} : vector<8x128xf32> to vector<8x64xf32>
    %239 = vector.extract_strided_slice %237 {offsets = [0, 64], sizes = [8, 64], strides = [1, 1]} : vector<8x128xf32> to vector<8x64xf32>
    %240 = vector.extract_strided_slice %225 {offsets = [0, 128], sizes = [8, 64], strides = [1, 1]} : vector<8x192xf32> to vector<8x64xf32>
    %241 = vector.extract_strided_slice %228 {offsets = [0, 128], sizes = [8, 64], strides = [1, 1]} : vector<8x192xf32> to vector<8x64xf32>
    %c0_84 = arith.constant 0 : index
    %c0_85 = arith.constant 0 : index
    %242 = vector.load %arg5[%c0_84, %c0_85] : memref<1x64xf32, #tpu.memory_space<vmem>>, vector<1x64xf32>
    %243 = vector.broadcast %242 : vector<1x64xf32> to vector<8x64xf32>
    %244 = arith.addf %241, %243 : vector<8x64xf32>
    %245 = arith.mulf %238, %244 : vector<8x64xf32>
    %246 = arith.addf %240, %245 : vector<8x64xf32>
    %247 = math.tanh %246 : vector<8x64xf32>
    %248 = arith.subf %196, %247 : vector<8x64xf32>
    %249 = arith.mulf %239, %248 : vector<8x64xf32>
    %250 = arith.addf %247, %249 : vector<8x64xf32>
    %251 = tpu.concatenate %250, %224 in 1 : vector<8x64xf32>, vector<8x64xf32> -> vector<8x128xf32>
    %252 = arith.truncf %251 : vector<8x128xf32> to vector<8x128xbf16>
    %c0_86 = arith.constant 0 : index
    %c0_87 = arith.constant 0 : index
    %253 = vector.load %arg3[%c0_86, %c0_87] : memref<128x256xbf16, #tpu.memory_space<vmem>>, vector<128x256xbf16>
    %cst_88 = arith.constant dense<0.000000e+00> : vector<8x256xf32>
    %254 = tpu.matmul %252, %253, %cst_88 {dimension_numbers = #tpu.dot_dimension_numbers<[1], [0], [0], [1], [0, 0, 1, 1], [], []>} : vector<8x128xbf16>, vector<128x256xbf16>, vector<8x256xf32> -> vector<8x256xf32>
    %255 = vector.extract_strided_slice %254 {offsets = [0, 0], sizes = [8, 128], strides = [1, 1]} : vector<8x256xf32> to vector<8x128xf32>
    %c0_89 = arith.constant 0 : index
    %c0_90 = arith.constant 0 : index
    %256 = vector.load %arg6[%c0_89, %c0_90] : memref<1x128xf32, #tpu.memory_space<vmem>>, vector<1x128xf32>
    %257 = vector.broadcast %256 : vector<1x128xf32> to vector<8x128xf32>
    %258 = arith.addf %255, %257 : vector<8x128xf32>
    %cst_91 = arith.constant 0.000000e+00 : f32
    %259 = vector.broadcast %cst_91 : f32 to vector<8x128xf32>
    %260 = arith.subf %259, %258 : vector<8x128xf32>
    %261 = math.exp %260 : vector<8x128xf32>
    %cst_92 = arith.constant 1.000000e+00 : f32
    %262 = vector.broadcast %cst_92 : f32 to vector<8x128xf32>
    %263 = arith.addf %262, %261 : vector<8x128xf32>
    %264 = tpu.reciprocal %263 {approx = true} : vector<8x128xf32> -> vector<8x128xf32>
    %265 = vector.extract_strided_slice %264 {offsets = [0, 0], sizes = [8, 64], strides = [1, 1]} : vector<8x128xf32> to vector<8x64xf32>
    %266 = vector.extract_strided_slice %264 {offsets = [0, 64], sizes = [8, 64], strides = [1, 1]} : vector<8x128xf32> to vector<8x64xf32>
    %267 = vector.extract_strided_slice %254 {offsets = [0, 128], sizes = [8, 128], strides = [1, 1]} : vector<8x256xf32> to vector<8x128xf32>
    %c0_93 = arith.constant 0 : index
    %c0_94 = arith.constant 0 : index
    %268 = vector.load %arg7[%c0_93, %c0_94] : memref<1x128xf32, #tpu.memory_space<vmem>>, vector<1x128xf32>
    %269 = vector.broadcast %268 : vector<1x128xf32> to vector<8x128xf32>
    %270 = arith.addf %267, %269 : vector<8x128xf32>
    %271 = vector.extract_strided_slice %270 {offsets = [0, 0], sizes = [8, 64], strides = [1, 1]} : vector<8x128xf32> to vector<8x64xf32>
    %272 = vector.extract_strided_slice %270 {offsets = [0, 64], sizes = [8, 64], strides = [1, 1]} : vector<8x128xf32> to vector<8x64xf32>
    %273 = arith.mulf %265, %272 : vector<8x64xf32>
    %274 = arith.addf %271, %273 : vector<8x64xf32>
    %275 = math.tanh %274 : vector<8x64xf32>
    %276 = arith.subf %224, %275 : vector<8x64xf32>
    %277 = arith.mulf %266, %276 : vector<8x64xf32>
    %278 = arith.addf %275, %277 : vector<8x64xf32>
    %c40 = arith.constant 40 : index
    %c0_95 = arith.constant 0 : index
    %279 = vector.load %arg11[%c40, %c0_95] : memref<64x192xf32, #tpu.memory_space<vmem>>, vector<8x192xf32>
    %280 = arith.truncf %250 : vector<8x64xf32> to vector<8x64xbf16>
    %c0_96 = arith.constant 0 : index
    %c0_97 = arith.constant 0 : index
    %281 = vector.load %arg2[%c0_96, %c0_97] : memref<64x192xbf16, #tpu.memory_space<vmem>>, vector<64x192xbf16>
    %cst_98 = arith.constant dense<0.000000e+00> : vector<8x192xf32>
    %282 = tpu.matmul %280, %281, %cst_98 {dimension_numbers = #tpu.dot_dimension_numbers<[1], [0], [0], [1], [0, 0, 1, 1], [], []>} : vector<8x64xbf16>, vector<64x192xbf16>, vector<8x192xf32> -> vector<8x192xf32>
    %283 = vector.extract_strided_slice %279 {offsets = [0, 0], sizes = [8, 128], strides = [1, 1]} : vector<8x192xf32> to vector<8x128xf32>
    %284 = vector.extract_strided_slice %282 {offsets = [0, 0], sizes = [8, 128], strides = [1, 1]} : vector<8x192xf32> to vector<8x128xf32>
    %285 = arith.addf %283, %284 : vector<8x128xf32>
    %cst_99 = arith.constant 0.000000e+00 : f32
    %286 = vector.broadcast %cst_99 : f32 to vector<8x128xf32>
    %287 = arith.subf %286, %285 : vector<8x128xf32>
    %288 = math.exp %287 : vector<8x128xf32>
    %cst_100 = arith.constant 1.000000e+00 : f32
    %289 = vector.broadcast %cst_100 : f32 to vector<8x128xf32>
    %290 = arith.addf %289, %288 : vector<8x128xf32>
    %291 = tpu.reciprocal %290 {approx = true} : vector<8x128xf32> -> vector<8x128xf32>
    %292 = vector.extract_strided_slice %291 {offsets = [0, 0], sizes = [8, 64], strides = [1, 1]} : vector<8x128xf32> to vector<8x64xf32>
    %293 = vector.extract_strided_slice %291 {offsets = [0, 64], sizes = [8, 64], strides = [1, 1]} : vector<8x128xf32> to vector<8x64xf32>
    %294 = vector.extract_strided_slice %279 {offsets = [0, 128], sizes = [8, 64], strides = [1, 1]} : vector<8x192xf32> to vector<8x64xf32>
    %295 = vector.extract_strided_slice %282 {offsets = [0, 128], sizes = [8, 64], strides = [1, 1]} : vector<8x192xf32> to vector<8x64xf32>
    %c0_101 = arith.constant 0 : index
    %c0_102 = arith.constant 0 : index
    %296 = vector.load %arg5[%c0_101, %c0_102] : memref<1x64xf32, #tpu.memory_space<vmem>>, vector<1x64xf32>
    %297 = vector.broadcast %296 : vector<1x64xf32> to vector<8x64xf32>
    %298 = arith.addf %295, %297 : vector<8x64xf32>
    %299 = arith.mulf %292, %298 : vector<8x64xf32>
    %300 = arith.addf %294, %299 : vector<8x64xf32>
    %301 = math.tanh %300 : vector<8x64xf32>
    %302 = arith.subf %250, %301 : vector<8x64xf32>
    %303 = arith.mulf %293, %302 : vector<8x64xf32>
    %304 = arith.addf %301, %303 : vector<8x64xf32>
    %305 = tpu.concatenate %304, %278 in 1 : vector<8x64xf32>, vector<8x64xf32> -> vector<8x128xf32>
    %306 = arith.truncf %305 : vector<8x128xf32> to vector<8x128xbf16>
    %c0_103 = arith.constant 0 : index
    %c0_104 = arith.constant 0 : index
    %307 = vector.load %arg3[%c0_103, %c0_104] : memref<128x256xbf16, #tpu.memory_space<vmem>>, vector<128x256xbf16>
    %cst_105 = arith.constant dense<0.000000e+00> : vector<8x256xf32>
    %308 = tpu.matmul %306, %307, %cst_105 {dimension_numbers = #tpu.dot_dimension_numbers<[1], [0], [0], [1], [0, 0, 1, 1], [], []>} : vector<8x128xbf16>, vector<128x256xbf16>, vector<8x256xf32> -> vector<8x256xf32>
    %309 = vector.extract_strided_slice %308 {offsets = [0, 0], sizes = [8, 128], strides = [1, 1]} : vector<8x256xf32> to vector<8x128xf32>
    %c0_106 = arith.constant 0 : index
    %c0_107 = arith.constant 0 : index
    %310 = vector.load %arg6[%c0_106, %c0_107] : memref<1x128xf32, #tpu.memory_space<vmem>>, vector<1x128xf32>
    %311 = vector.broadcast %310 : vector<1x128xf32> to vector<8x128xf32>
    %312 = arith.addf %309, %311 : vector<8x128xf32>
    %cst_108 = arith.constant 0.000000e+00 : f32
    %313 = vector.broadcast %cst_108 : f32 to vector<8x128xf32>
    %314 = arith.subf %313, %312 : vector<8x128xf32>
    %315 = math.exp %314 : vector<8x128xf32>
    %cst_109 = arith.constant 1.000000e+00 : f32
    %316 = vector.broadcast %cst_109 : f32 to vector<8x128xf32>
    %317 = arith.addf %316, %315 : vector<8x128xf32>
    %318 = tpu.reciprocal %317 {approx = true} : vector<8x128xf32> -> vector<8x128xf32>
    %319 = vector.extract_strided_slice %318 {offsets = [0, 0], sizes = [8, 64], strides = [1, 1]} : vector<8x128xf32> to vector<8x64xf32>
    %320 = vector.extract_strided_slice %318 {offsets = [0, 64], sizes = [8, 64], strides = [1, 1]} : vector<8x128xf32> to vector<8x64xf32>
    %321 = vector.extract_strided_slice %308 {offsets = [0, 128], sizes = [8, 128], strides = [1, 1]} : vector<8x256xf32> to vector<8x128xf32>
    %c0_110 = arith.constant 0 : index
    %c0_111 = arith.constant 0 : index
    %322 = vector.load %arg7[%c0_110, %c0_111] : memref<1x128xf32, #tpu.memory_space<vmem>>, vector<1x128xf32>
    %323 = vector.broadcast %322 : vector<1x128xf32> to vector<8x128xf32>
    %324 = arith.addf %321, %323 : vector<8x128xf32>
    %325 = vector.extract_strided_slice %324 {offsets = [0, 0], sizes = [8, 64], strides = [1, 1]} : vector<8x128xf32> to vector<8x64xf32>
    %326 = vector.extract_strided_slice %324 {offsets = [0, 64], sizes = [8, 64], strides = [1, 1]} : vector<8x128xf32> to vector<8x64xf32>
    %327 = arith.mulf %319, %326 : vector<8x64xf32>
    %328 = arith.addf %325, %327 : vector<8x64xf32>
    %329 = math.tanh %328 : vector<8x64xf32>
    %330 = arith.subf %278, %329 : vector<8x64xf32>
    %331 = arith.mulf %320, %330 : vector<8x64xf32>
    %332 = arith.addf %329, %331 : vector<8x64xf32>
    %c48 = arith.constant 48 : index
    %c0_112 = arith.constant 0 : index
    %333 = vector.load %arg11[%c48, %c0_112] : memref<64x192xf32, #tpu.memory_space<vmem>>, vector<8x192xf32>
    %334 = arith.truncf %304 : vector<8x64xf32> to vector<8x64xbf16>
    %c0_113 = arith.constant 0 : index
    %c0_114 = arith.constant 0 : index
    %335 = vector.load %arg2[%c0_113, %c0_114] : memref<64x192xbf16, #tpu.memory_space<vmem>>, vector<64x192xbf16>
    %cst_115 = arith.constant dense<0.000000e+00> : vector<8x192xf32>
    %336 = tpu.matmul %334, %335, %cst_115 {dimension_numbers = #tpu.dot_dimension_numbers<[1], [0], [0], [1], [0, 0, 1, 1], [], []>} : vector<8x64xbf16>, vector<64x192xbf16>, vector<8x192xf32> -> vector<8x192xf32>
    %337 = vector.extract_strided_slice %333 {offsets = [0, 0], sizes = [8, 128], strides = [1, 1]} : vector<8x192xf32> to vector<8x128xf32>
    %338 = vector.extract_strided_slice %336 {offsets = [0, 0], sizes = [8, 128], strides = [1, 1]} : vector<8x192xf32> to vector<8x128xf32>
    %339 = arith.addf %337, %338 : vector<8x128xf32>
    %cst_116 = arith.constant 0.000000e+00 : f32
    %340 = vector.broadcast %cst_116 : f32 to vector<8x128xf32>
    %341 = arith.subf %340, %339 : vector<8x128xf32>
    %342 = math.exp %341 : vector<8x128xf32>
    %cst_117 = arith.constant 1.000000e+00 : f32
    %343 = vector.broadcast %cst_117 : f32 to vector<8x128xf32>
    %344 = arith.addf %343, %342 : vector<8x128xf32>
    %345 = tpu.reciprocal %344 {approx = true} : vector<8x128xf32> -> vector<8x128xf32>
    %346 = vector.extract_strided_slice %345 {offsets = [0, 0], sizes = [8, 64], strides = [1, 1]} : vector<8x128xf32> to vector<8x64xf32>
    %347 = vector.extract_strided_slice %345 {offsets = [0, 64], sizes = [8, 64], strides = [1, 1]} : vector<8x128xf32> to vector<8x64xf32>
    %348 = vector.extract_strided_slice %333 {offsets = [0, 128], sizes = [8, 64], strides = [1, 1]} : vector<8x192xf32> to vector<8x64xf32>
    %349 = vector.extract_strided_slice %336 {offsets = [0, 128], sizes = [8, 64], strides = [1, 1]} : vector<8x192xf32> to vector<8x64xf32>
    %c0_118 = arith.constant 0 : index
    %c0_119 = arith.constant 0 : index
    %350 = vector.load %arg5[%c0_118, %c0_119] : memref<1x64xf32, #tpu.memory_space<vmem>>, vector<1x64xf32>
    %351 = vector.broadcast %350 : vector<1x64xf32> to vector<8x64xf32>
    %352 = arith.addf %349, %351 : vector<8x64xf32>
    %353 = arith.mulf %346, %352 : vector<8x64xf32>
    %354 = arith.addf %348, %353 : vector<8x64xf32>
    %355 = math.tanh %354 : vector<8x64xf32>
    %356 = arith.subf %304, %355 : vector<8x64xf32>
    %357 = arith.mulf %347, %356 : vector<8x64xf32>
    %358 = arith.addf %355, %357 : vector<8x64xf32>
    %359 = tpu.concatenate %358, %332 in 1 : vector<8x64xf32>, vector<8x64xf32> -> vector<8x128xf32>
    %360 = arith.truncf %359 : vector<8x128xf32> to vector<8x128xbf16>
    %c0_120 = arith.constant 0 : index
    %c0_121 = arith.constant 0 : index
    %361 = vector.load %arg3[%c0_120, %c0_121] : memref<128x256xbf16, #tpu.memory_space<vmem>>, vector<128x256xbf16>
    %cst_122 = arith.constant dense<0.000000e+00> : vector<8x256xf32>
    %362 = tpu.matmul %360, %361, %cst_122 {dimension_numbers = #tpu.dot_dimension_numbers<[1], [0], [0], [1], [0, 0, 1, 1], [], []>} : vector<8x128xbf16>, vector<128x256xbf16>, vector<8x256xf32> -> vector<8x256xf32>
    %363 = vector.extract_strided_slice %362 {offsets = [0, 0], sizes = [8, 128], strides = [1, 1]} : vector<8x256xf32> to vector<8x128xf32>
    %c0_123 = arith.constant 0 : index
    %c0_124 = arith.constant 0 : index
    %364 = vector.load %arg6[%c0_123, %c0_124] : memref<1x128xf32, #tpu.memory_space<vmem>>, vector<1x128xf32>
    %365 = vector.broadcast %364 : vector<1x128xf32> to vector<8x128xf32>
    %366 = arith.addf %363, %365 : vector<8x128xf32>
    %cst_125 = arith.constant 0.000000e+00 : f32
    %367 = vector.broadcast %cst_125 : f32 to vector<8x128xf32>
    %368 = arith.subf %367, %366 : vector<8x128xf32>
    %369 = math.exp %368 : vector<8x128xf32>
    %cst_126 = arith.constant 1.000000e+00 : f32
    %370 = vector.broadcast %cst_126 : f32 to vector<8x128xf32>
    %371 = arith.addf %370, %369 : vector<8x128xf32>
    %372 = tpu.reciprocal %371 {approx = true} : vector<8x128xf32> -> vector<8x128xf32>
    %373 = vector.extract_strided_slice %372 {offsets = [0, 0], sizes = [8, 64], strides = [1, 1]} : vector<8x128xf32> to vector<8x64xf32>
    %374 = vector.extract_strided_slice %372 {offsets = [0, 64], sizes = [8, 64], strides = [1, 1]} : vector<8x128xf32> to vector<8x64xf32>
    %375 = vector.extract_strided_slice %362 {offsets = [0, 128], sizes = [8, 128], strides = [1, 1]} : vector<8x256xf32> to vector<8x128xf32>
    %c0_127 = arith.constant 0 : index
    %c0_128 = arith.constant 0 : index
    %376 = vector.load %arg7[%c0_127, %c0_128] : memref<1x128xf32, #tpu.memory_space<vmem>>, vector<1x128xf32>
    %377 = vector.broadcast %376 : vector<1x128xf32> to vector<8x128xf32>
    %378 = arith.addf %375, %377 : vector<8x128xf32>
    %379 = vector.extract_strided_slice %378 {offsets = [0, 0], sizes = [8, 64], strides = [1, 1]} : vector<8x128xf32> to vector<8x64xf32>
    %380 = vector.extract_strided_slice %378 {offsets = [0, 64], sizes = [8, 64], strides = [1, 1]} : vector<8x128xf32> to vector<8x64xf32>
    %381 = arith.mulf %373, %380 : vector<8x64xf32>
    %382 = arith.addf %379, %381 : vector<8x64xf32>
    %383 = math.tanh %382 : vector<8x64xf32>
    %384 = arith.subf %332, %383 : vector<8x64xf32>
    %385 = arith.mulf %374, %384 : vector<8x64xf32>
    %386 = arith.addf %383, %385 : vector<8x64xf32>
    %c56 = arith.constant 56 : index
    %c0_129 = arith.constant 0 : index
    %387 = vector.load %arg11[%c56, %c0_129] : memref<64x192xf32, #tpu.memory_space<vmem>>, vector<8x192xf32>
    %388 = arith.truncf %358 : vector<8x64xf32> to vector<8x64xbf16>
    %c0_130 = arith.constant 0 : index
    %c0_131 = arith.constant 0 : index
    %389 = vector.load %arg2[%c0_130, %c0_131] : memref<64x192xbf16, #tpu.memory_space<vmem>>, vector<64x192xbf16>
    %cst_132 = arith.constant dense<0.000000e+00> : vector<8x192xf32>
    %390 = tpu.matmul %388, %389, %cst_132 {dimension_numbers = #tpu.dot_dimension_numbers<[1], [0], [0], [1], [0, 0, 1, 1], [], []>} : vector<8x64xbf16>, vector<64x192xbf16>, vector<8x192xf32> -> vector<8x192xf32>
    %391 = vector.extract_strided_slice %387 {offsets = [0, 0], sizes = [8, 128], strides = [1, 1]} : vector<8x192xf32> to vector<8x128xf32>
    %392 = vector.extract_strided_slice %390 {offsets = [0, 0], sizes = [8, 128], strides = [1, 1]} : vector<8x192xf32> to vector<8x128xf32>
    %393 = arith.addf %391, %392 : vector<8x128xf32>
    %cst_133 = arith.constant 0.000000e+00 : f32
    %394 = vector.broadcast %cst_133 : f32 to vector<8x128xf32>
    %395 = arith.subf %394, %393 : vector<8x128xf32>
    %396 = math.exp %395 : vector<8x128xf32>
    %cst_134 = arith.constant 1.000000e+00 : f32
    %397 = vector.broadcast %cst_134 : f32 to vector<8x128xf32>
    %398 = arith.addf %397, %396 : vector<8x128xf32>
    %399 = tpu.reciprocal %398 {approx = true} : vector<8x128xf32> -> vector<8x128xf32>
    %400 = vector.extract_strided_slice %399 {offsets = [0, 0], sizes = [8, 64], strides = [1, 1]} : vector<8x128xf32> to vector<8x64xf32>
    %401 = vector.extract_strided_slice %399 {offsets = [0, 64], sizes = [8, 64], strides = [1, 1]} : vector<8x128xf32> to vector<8x64xf32>
    %402 = vector.extract_strided_slice %387 {offsets = [0, 128], sizes = [8, 64], strides = [1, 1]} : vector<8x192xf32> to vector<8x64xf32>
    %403 = vector.extract_strided_slice %390 {offsets = [0, 128], sizes = [8, 64], strides = [1, 1]} : vector<8x192xf32> to vector<8x64xf32>
    %c0_135 = arith.constant 0 : index
    %c0_136 = arith.constant 0 : index
    %404 = vector.load %arg5[%c0_135, %c0_136] : memref<1x64xf32, #tpu.memory_space<vmem>>, vector<1x64xf32>
    %405 = vector.broadcast %404 : vector<1x64xf32> to vector<8x64xf32>
    %406 = arith.addf %403, %405 : vector<8x64xf32>
    %407 = arith.mulf %400, %406 : vector<8x64xf32>
    %408 = arith.addf %402, %407 : vector<8x64xf32>
    %409 = math.tanh %408 : vector<8x64xf32>
    %410 = arith.subf %358, %409 : vector<8x64xf32>
    %411 = arith.mulf %401, %410 : vector<8x64xf32>
    %412 = arith.addf %409, %411 : vector<8x64xf32>
    %413 = tpu.concatenate %412, %386 in 1 : vector<8x64xf32>, vector<8x64xf32> -> vector<8x128xf32>
    %414 = arith.truncf %413 : vector<8x128xf32> to vector<8x128xbf16>
    %c0_137 = arith.constant 0 : index
    %c0_138 = arith.constant 0 : index
    %415 = vector.load %arg3[%c0_137, %c0_138] : memref<128x256xbf16, #tpu.memory_space<vmem>>, vector<128x256xbf16>
    %cst_139 = arith.constant dense<0.000000e+00> : vector<8x256xf32>
    %416 = tpu.matmul %414, %415, %cst_139 {dimension_numbers = #tpu.dot_dimension_numbers<[1], [0], [0], [1], [0, 0, 1, 1], [], []>} : vector<8x128xbf16>, vector<128x256xbf16>, vector<8x256xf32> -> vector<8x256xf32>
    %417 = vector.extract_strided_slice %416 {offsets = [0, 0], sizes = [8, 128], strides = [1, 1]} : vector<8x256xf32> to vector<8x128xf32>
    %c0_140 = arith.constant 0 : index
    %c0_141 = arith.constant 0 : index
    %418 = vector.load %arg6[%c0_140, %c0_141] : memref<1x128xf32, #tpu.memory_space<vmem>>, vector<1x128xf32>
    %419 = vector.broadcast %418 : vector<1x128xf32> to vector<8x128xf32>
    %420 = arith.addf %417, %419 : vector<8x128xf32>
    %cst_142 = arith.constant 0.000000e+00 : f32
    %421 = vector.broadcast %cst_142 : f32 to vector<8x128xf32>
    %422 = arith.subf %421, %420 : vector<8x128xf32>
    %423 = math.exp %422 : vector<8x128xf32>
    %cst_143 = arith.constant 1.000000e+00 : f32
    %424 = vector.broadcast %cst_143 : f32 to vector<8x128xf32>
    %425 = arith.addf %424, %423 : vector<8x128xf32>
    %426 = tpu.reciprocal %425 {approx = true} : vector<8x128xf32> -> vector<8x128xf32>
    %427 = vector.extract_strided_slice %426 {offsets = [0, 0], sizes = [8, 64], strides = [1, 1]} : vector<8x128xf32> to vector<8x64xf32>
    %428 = vector.extract_strided_slice %426 {offsets = [0, 64], sizes = [8, 64], strides = [1, 1]} : vector<8x128xf32> to vector<8x64xf32>
    %429 = vector.extract_strided_slice %416 {offsets = [0, 128], sizes = [8, 128], strides = [1, 1]} : vector<8x256xf32> to vector<8x128xf32>
    %c0_144 = arith.constant 0 : index
    %c0_145 = arith.constant 0 : index
    %430 = vector.load %arg7[%c0_144, %c0_145] : memref<1x128xf32, #tpu.memory_space<vmem>>, vector<1x128xf32>
    %431 = vector.broadcast %430 : vector<1x128xf32> to vector<8x128xf32>
    %432 = arith.addf %429, %431 : vector<8x128xf32>
    %433 = vector.extract_strided_slice %432 {offsets = [0, 0], sizes = [8, 64], strides = [1, 1]} : vector<8x128xf32> to vector<8x64xf32>
    %434 = vector.extract_strided_slice %432 {offsets = [0, 64], sizes = [8, 64], strides = [1, 1]} : vector<8x128xf32> to vector<8x64xf32>
    %435 = arith.mulf %427, %434 : vector<8x64xf32>
    %436 = arith.addf %433, %435 : vector<8x64xf32>
    %437 = math.tanh %436 : vector<8x64xf32>
    %438 = arith.subf %386, %437 : vector<8x64xf32>
    %439 = arith.mulf %428, %438 : vector<8x64xf32>
    %440 = arith.addf %437, %439 : vector<8x64xf32>
    %cst_146 = arith.constant dense<0.000000e+00> : vector<64xf32>
    %441 = vector.multi_reduction <add>, %440, %cst_146 [0] : vector<8x64xf32> to vector<64xf32>
    %442 = vector.shape_cast %441 : vector<64xf32> to vector<1x64xf32>
    %cst_147 = arith.constant 8.000000e+00 : f32
    %443 = vector.broadcast %cst_147 : f32 to vector<1x64xf32>
    %444 = arith.divf %442, %443 : vector<1x64xf32>
    %c0_148 = arith.constant 0 : index
    %c0_149 = arith.constant 0 : index
    %445 = vector.load %arg8[%c0_148, %c0_149] : memref<1x64xf32, #tpu.memory_space<vmem>>, vector<1x64xf32>
    %446 = arith.mulf %444, %445 : vector<1x64xf32>
    %cst_150 = arith.constant dense<0.000000e+00> : vector<1xf32>
    %447 = vector.multi_reduction <add>, %446, %cst_150 [1] : vector<1x64xf32> to vector<1xf32>
    %448 = vector.shape_cast %447 : vector<1xf32> to vector<1x1xf32>
    %c0_151 = arith.constant 0 : index
    %c0_152 = arith.constant 0 : index
    %449 = vector.load %arg9[%c0_151, %c0_152] : memref<1x1xf32, #tpu.memory_space<vmem>>, vector<1x1xf32>
    %450 = arith.addf %448, %449 : vector<1x1xf32>
    %451 = vector.shape_cast %450 : vector<1x1xf32> to vector<1x1xf32>
    %452 = vector.broadcast %451 : vector<1x1xf32> to vector<8x1xf32>
    %c0_153 = arith.constant 0 : index
    %c0_154 = arith.constant 0 : index
    %453 = vector.load %arg10[%c0_153, %c0_154] : memref<8x1xf32, #tpu.memory_space<vmem>>, vector<8x1xf32>
    tpu.vector_store %arg10[%c0_153, %c0_154], %452 {strides = array<i32>} : memref<8x1xf32, #tpu.memory_space<vmem>>, vector<8x1xf32>,
    return
  }
}

</mosaic_0001>

<bundles_post_ra>
// kernel: tpu_custom_call.1
= control target key start
LH: loop header
LB: loop body
LE: loop exit
PB: predicated region body
PF: predicated region fallthrough
CT: control target
= control target key end

     0   :  { %s2360_s0 = inlined_call_operand.vmem [shape: bf16[64,16], index: 0, kind: input, shape index: {}]   ;;  %s2361_s1 = inlined_call_operand.vmem [shape: bf16[16,192], index: 1, kind: input, shape index: {}]   ;;  %s2362_s2 = inlined_call_operand.hbm [shape: bf16[64,192], index: 2, kind: input, shape index: {}]   ;;  %s2363_s3 = inlined_call_operand.hbm [shape: bf16[128,256], index: 3, kind: input, shape index: {}]   ;;  %s2364_s4 = inlined_call_operand.vmem [shape: f32[1,192], index: 4, kind: input, shape index: {}]   ;;  %s2365_s5 = inlined_call_operand.vmem [shape: f32[1,64], index: 5, kind: input, shape index: {}]   ;;  %s2366_s6 = inlined_call_operand.vmem [shape: f32[1,128], index: 6, kind: input, shape index: {}]   ;;  %s2367_s7 = inlined_call_operand.vmem [shape: f32[1,128], index: 7, kind: input, shape index: {}]   ;;  %s2368_s8 = inlined_call_operand.vmem [shape: f32[1,64], index: 8, kind: input, shape index: {}]   ;;  %s2369_s9 = inlined_call_operand.<no memory space> [shape: f32[1,1], index: 9, kind: input, shape index: {}]   ;;  %s2370_s10 = inlined_call_operand.vmem [shape: f32[8,1], index: 10, kind: output, shape index: {}]  }
   0x1   :  { %v15_v0 = vstv %s2369_s9 }
   0x2   :  { %16 = vst [vmem:[#allocation3] sm:$0x1] %v15_v0 }
   0x3   :  { %17 = vsyncpa [#allocation5], 0 }
   0x4   :  { %18 = vsyncpa [#allocation7], 0  ;;  %s1794_s15 = smov [#allocation4]  }
   0x5   :  { %s28_s16 = sshll.u32 %s1794_s15, 4  ;;  %s29_s16 = int_to_ptr.vmem [resolvable:$true] %s28_s16 }
   0x6   :  { %s1758_s17 = scalar_lea.vmem %s29_s16, 1024  ;;  %p1763_p1 = scmp.lt.s32.totalorder %s29_s16, %s29_s16 }
   0x7   :  { %p1759_p0 = scmp.ne.s32.totalorder %s29_s16, %s1758_s17  ;;  %p1764_p2 = scmp.lt.s32.totalorder %s1758_s17, %s1758_s17 }
   0x9   :  { %p1765_p3 = por %p1764_p2, %p1763_p1 }
   0xb   :  { %p1766_p4 = pnand %p1765_p3, %p1759_p0 }
   0xd   :  { %1769 = shalt.err (!%p1766_p4)
}
   0xe   :  { %s1795_s18 = smov 128   ;;  %s1796_s19 = smov 8  }
   0xf   :  { %34 = dma.hbm_to_vmem [thread:$0]  %s2362_s2, 1024, %s29_s16, [#allocation5], %s1795_s18, %s1795_s18, %s1796_s19  }
  0x10   :  { %s1797_s9 = smov [#allocation6]  }
  0x11   :  { %s40_s22 = sshll.u32 %s1797_s9, 4  ;;  %s41_s22 = int_to_ptr.vmem [resolvable:$true] %s40_s22 }
  0x12   :  { %s1778_s23 = scalar_lea.vmem %s41_s22, 2048  ;;  %p1783_p6 = scmp.lt.s32.totalorder %s41_s22, %s41_s22 }
  0x13   :  { %p1779_p5 = scmp.ne.s32.totalorder %s41_s22, %s1778_s23  ;;  %p1784_p7 = scmp.lt.s32.totalorder %s1778_s23, %s1778_s23 }
  0x15   :  { %p1785_p8 = por %p1784_p7, %p1783_p6 }
  0x17   :  { %p1786_p9 = pnand %p1785_p8, %p1779_p5 }
  0x19   :  { %1789 = shalt.err (!%p1786_p9)
}
  0x1a   :  { %46 = dma.hbm_to_vmem [thread:$0]  %s2363_s3, 2048, %s41_s22, [#allocation7], %s1795_s18, %s1795_s18, %s1796_s19  }
  0x1b   :  { %1790 = dma.done.wait [#allocation5], 1024  }
  0x1c   :  { %1791 = vsyncadd [#allocation5], 4294966272 }
  0x1d   :  { %1792 = dma.done.wait [#allocation7], 2048  }
  0x1e   :  { %1793 = vsyncadd [#allocation7], 4294965248  ;;  %v1798_v1 = vmov 0   ;;  %v1583_v2 = vld [vmem:[%s2361_s1 + $0x4] ss:$8 sps:$4 sm:$0xff]   ;;  %vm118_vm0 = vcmask 130048   ;;  %v78_v13 = vlaneseq }
  0x1f   :  { %163 = vmatprep.mubr.bf16.mxu0 %v1798_v1  ;;  %306 = vmatprep.mubr.bf16.mxu1 %v1798_v1  ;;  %v1869_v3 = vld [vmem:[#allocation4 + $0x34] ss:$8 sps:$4 sm:$0xff]   ;;  %v1874_v5 = vld [vmem:[#allocation4 + $0x30] ss:$8 sps:$4 sm:$0xff]   ;;  %v1881_v7 = vld [vmem:[#allocation4 + $0x24] ss:$8 sps:$4 sm:$0xff]  }
  0x20   :  { %145 = vmatprep.subr.bf16.mxu0 %v1583_v2  ;;  %v1587_v4 = vld [vmem:[%s2361_s1] ss:$8 sps:$4 sm:$0xff]   ;;  %282 = vmatprep.subr.bf16.mxu1 %v1869_v3  ;;  %v1889_v10 = vld [vmem:[#allocation4 + $0x10] ss:$8 sps:$4 sm:$0xff]   ;;  %v1903_v14 = vshrl.u32 %v78_v13, 7  ;;  %vm205_vm1 = vcmask 523264  }
  0x21   :  { %v1589_v6 = vld [vmem:[%s2360_s0] sm:$0xff]   ;;  %146 = vmatpush1.bf16.msra.mxu0 %v1587_v4  ;;  %283 = vmatpush1.bf16.msra.mxu1 %v1874_v5  ;;  %v1935_v44 = vld [vmem:[#allocation6 + $0x70] ss:$8 sps:$4 sm:$0xff]   ;;  %v1602_v45 = vld [vmem:[%s2360_s0 + $0x8] sm:$0xff]   ;;  %s1799_s16 = smov 64   ;;  %vm1512_vm3 = vcmask 516096  }
  0x22   :  { %v1883_v8 = vld [vmem:[#allocation4 + $0x20] ss:$8 sps:$4 sm:$0xff]   ;;  %v1885_v9 = vld [vmem:[#allocation4 + $0x14] ss:$8 sps:$4 sm:$0xff]   ;;  %284 = vmatprep.subr.bf16.mxu1 %v1881_v7  ;;  %v1891_v11 = vld [vmem:[#allocation4 + $0x4] ss:$8 sps:$4 sm:$0xff]  }
  0x23   :  { %v1896_v12 = vld [vmem:[#allocation4] ss:$8 sps:$4 sm:$0xff]   ;;  %v80_v15 = vsub.s32 0, %v1903_v14  ;;  %v84_v17 = vsub.s32 1, %v1903_v14  ;;  %v1927_v37 = vld [vmem:[%s2365_s5] ss:$0 sm:$0xff]  ;;  %vm1565_vm2 = vmpackc.low %vm205_vm1, %vm205_vm1 }
  0x24   :  { %1536 = vmatmul.mubr.msk.bf16.vlgmr.msra.gmra.mxu0 %vm118_vm0, %v1589_v6  ;;  %v76_v16 = vld [vmem:[%s2364_s4] sm:$0x3]  ;;  %v1940_v46 = vld [vmem:[#allocation6 + $0x64] ss:$8 sps:$4 sm:$0xff]   ;;  %v1958_v50 = vld [vmem:[#allocation6 + $0x50] ss:$8 sps:$4 sm:$0xff]  }
  0x25   :  { %285 = vmatpush1.bf16.msra.mxu1 %v1883_v8  ;;  %173 = vmatprep.mubr.bf16.mxu0 %v1798_v1  ;;  %v1912_v18 = vrot.slane %v76_v16, %v80_v15  ;;  %v1914_v19 = vrot.slane %v76_v16, %v84_v17  ;;  %v1933_v43 = vld [vmem:[#allocation6 + $0x74] ss:$8 sps:$4 sm:$0xff]   ;;  %v1945_v47 = vld [vmem:[#allocation6 + $0x60] ss:$8 sps:$4 sm:$0xff]   ;;  %v1963_v52 = vld [vmem:[#allocation6 + $0x44] ss:$8 sps:$4 sm:$0xff]  }
  0x26   :  { %286 = vmatprep.subr.bf16.mxu1 %v1885_v9  ;;  %441 = vmatprep.subr.bf16.mxu0 %v1933_v43  ;;  %v1949_v48 = vld [vmem:[#allocation6 + $0x54] ss:$8 sps:$4 sm:$0xff]   ;;  %v1971_v54 = vld [vmem:[#allocation6 + $0x40] ss:$8 sps:$4 sm:$0xff]   ;;  %v1983_v57 = vld [vmem:[#allocation6 + $0x30] ss:$8 sps:$4 sm:$0xff]  }
  0x27   :  { %442 = vmatpush1.bf16.msra.mxu0 %v1935_v44  ;;  %v1609_v49 = vld [vmem:[%s2360_s0 + $0x10] sm:$0xff]   ;;  %v1616_v56 = vld [vmem:[%s2360_s0 + $0x18] sm:$0xff]   ;;  %v1992_v59 = vld [vmem:[#allocation6 + $0x20] ss:$8 sps:$4 sm:$0xff]   ;;  %vm1522_vm4 = vcmask 7168  }
  0x28   :  { %443 = vmatprep.subr.bf16.mxu0 %v1940_v46  ;;  %v1974_v55 = vld [vmem:[#allocation6 + $0x34] ss:$8 sps:$4 sm:$0xff]   ;;  %v1986_v58 = vld [vmem:[#allocation6 + $0x24] ss:$8 sps:$4 sm:$0xff]   ;;  %v2001_v61 = vld [vmem:[#allocation6 + $0x10] ss:$8 sps:$4 sm:$0xff]  }
  0x29   :  { %287 = vmatpush1.bf16.msra.mxu1 %v1889_v10  ;;  %v1996_v60 = vld [vmem:[#allocation6 + $0x14] ss:$8 sps:$4 sm:$0xff]   ;;  %v2004_v62 = vld [vmem:[#allocation6 + $0x4] ss:$8 sps:$4 sm:$0xff]   ;;  %v2012_v63 = vld [vmem:[#allocation6] ss:$8 sps:$4 sm:$0xff]  }
  0x2a   :  { %288 = vmatprep.subr.bf16.mxu1 %v1891_v11 }
  0x2b   :  { %444 = vmatpush1.bf16.msra.mxu0 %v1945_v47 }
  0x2c   :  { %1537 = vmatmul.mubr.msk.bf16.gmra.mxu0 %vm118_vm0, %v1602_v45  ;;  %445 = vmatprep.subr.bf16.mxu0 %v1949_v48 }
  0x2d   :  { %289 = vmatpush1.bf16.msra.mxu1 %v1896_v12  ;;  %183 = vmatprep.mubr.bf16.mxu0 %v1798_v1 }
  0x2e   :  { %595 = vmatprep.subr.bf16.mxu1 %v1933_v43 }
  0x2f   :  { %446 = vmatpush1.bf16.msra.mxu0 %v1958_v50 }
  0x30   :  { %307 = vmatmul.mubr.bf16.vlgmr.msra.gmra.mxu1 %v1798_v1  ;;  %447 = vmatprep.subr.bf16.mxu0 %v1963_v52 }
  0x31   :  { %627 = vmatprep.mubr.bf16.mxu1 %v1798_v1  ;;  %596 = vmatpush1.bf16.msra.mxu1 %v1935_v44 }
  0x32   :  { %597 = vmatprep.subr.bf16.mxu1 %v1940_v46 }
  0x33   :  { %448 = vmatpush1.bf16.msra.mxu0 %v1971_v54 }
  0x34   :  { %1538 = vmatmul.mubr.msk.bf16.gmra.mxu0 %vm118_vm0, %v1609_v49  ;;  %449 = vmatprep.subr.bf16.mxu0 %v1974_v55 }
  0x35   :  { %598 = vmatpush1.bf16.msra.mxu1 %v1945_v47  ;;  %193 = vmatprep.mubr.bf16.mxu0 %v1798_v1 }
  0x36   :  { %599 = vmatprep.subr.bf16.mxu1 %v1949_v48 }
  0x37   :  { %450 = vmatpush1.bf16.msra.mxu0 %v1983_v57 }
  0x38   :  { %451 = vmatprep.subr.bf16.mxu0 %v1986_v58 }
  0x39   :  { %600 = vmatpush1.bf16.msra.mxu1 %v1958_v50 }
  0x3a   :  { %601 = vmatprep.subr.bf16.mxu1 %v1963_v52 }
  0x3b   :  { %452 = vmatpush1.bf16.msra.mxu0 %v1992_v59 }
  0x3c   :  { %1539 = vmatmul.mubr.msk.bf16.gmra.mxu0 %vm118_vm0, %v1616_v56  ;;  %453 = vmatprep.subr.bf16.mxu0 %v1996_v60 }
  0x3d   :  { %602 = vmatpush1.bf16.msra.mxu1 %v1971_v54  ;;  %473 = vmatprep.mubr.bf16.mxu0 %v1798_v1 }
  0x3e   :  { %603 = vmatprep.subr.bf16.mxu1 %v1974_v55 }
  0x3f   :  { %454 = vmatpush1.bf16.msra.mxu0 %v2001_v61 }
  0x40   :  { %455 = vmatprep.subr.bf16.mxu0 %v2004_v62 }
  0x41   :  { %604 = vmatpush1.bf16.msra.mxu1 %v1983_v57 }
  0x42   :  { %605 = vmatprep.subr.bf16.mxu1 %v1986_v58 }
  0x43   :  { %456 = vmatpush1.bf16.msra.mxu0 %v2012_v63 }
  0x44   :  { %535 = vmatprep.subr.bf16.mxu0 %v1869_v3 }
  0x45   :  { %606 = vmatpush1.bf16.msra.mxu1 %v1992_v59 }
  0x46   :  { %607 = vmatprep.subr.bf16.mxu1 %v1996_v60 }
  0x49   :  { %608 = vmatpush1.bf16.msra.mxu1 %v2001_v61 }
  0x4a   :  { %609 = vmatprep.subr.bf16.mxu1 %v2004_v62 }
  0x4d   :  { %610 = vmatpush1.bf16.msra.mxu1 %v2012_v63 }
  0x4e   :  { %815 = vmatprep.subr.bf16.mxu1 %v1869_v3 }
  0xe4   :  { %v165_v20 = vpop.f32.mrf.mxu0 }
  0xe5   :  { %v166_v21 = vadd.f32 %v165_v20, %v1912_v18 }
  0xe6   :  { %v167_v22 = vpop.f32.mrf.mxu0 }
  0xe7   :  { %v168_v23 = vadd.f32 %v167_v22, %v1914_v19 }
  0xe8   :  { %v169_v24 = vpop.f32.mrf.mxu0 }
  0xe9   :  { %206 = vst.msk [vmem:[#allocation2 + $0x8] sm:$0xff] %vm205_vm1, %v168_v23  ;;  %v1920_v25 = vadd.f32 %v169_v24, %v1912_v18 }
  0xea   :  { %v171_v26 = vpop.f32.mrf.mxu0 }
  0xeb   :  { %v172_v27 = vadd.f32 %v171_v26, %v1914_v19 }
  0xec   :  { %v175_v4 = vpop.f32.mrf.mxu0 }
  0xed   :  { %208 = vst.msk [vmem:[#allocation2 + $0x18] sm:$0xff] %vm205_vm1, %v172_v27  ;;  %v2021_v6 = vadd.f32 %v175_v4, %v1912_v18 }
  0xee   :  { %v177_v13 = vpop.f32.mrf.mxu0 }
  0xef   :  { %v178_v16 = vadd.f32 %v177_v13, %v1914_v19 }
  0xf0   :  { %v308_v28 = vpop.f32.mrf.mxu1  ;;  %v222_v41 = vld [vmem:[#allocation2 + $0x8] sm:$0xff]  ;;  %v179_v17 = vpop.f32.mrf.mxu0 }
  0xf1   :  { %v315_v29 = vadd.f32 %v308_v28, %v166_v21  ;;  %210 = vst.msk [vmem:[#allocation2 + $0x28] sm:$0xff] %vm205_vm1, %v178_v16  ;;  %v2026_v20 = vadd.f32 %v179_v17, %v1912_v18 }
  0xf2   :  { %v310_v30 = vpop.f32.mrf.mxu1  ;;  %v181_v21 = vpop.f32.mrf.mxu0 }
  0xf3   :  { %v316_v31 = vsub.f32 0.0, %v315_v29  ;;  %v328_v38 = vadd.f32 %v1927_v37, %v310_v30  ;;  %v182_v22 = vadd.f32 %v181_v21, %v1914_v19 }
  0xf4   :  { %v312_v32 = vpop.f32.mrf.mxu1  ;;  %v185_v23 = vpop.f32.mrf.mxu0 }
  0xf5   :  { %v317_v33 = vmul.f32 1.442695, %v316_v31  ;;  %212 = vst.msk [vmem:[#allocation2 + $0x38] sm:$0xff] %vm205_vm1, %v182_v22  ;;  %v2031_v24 = vadd.f32 %v185_v23, %v1912_v18 }
  0xf6   :  { %v313_v34 = vpop.f32.mrf.mxu1  ;;  %v187_v26 = vpop.f32.mrf.mxu0 }
  0xf7   :  { %1626 = vpow2.f32 %v317_v33  ;;  %v188_v27 = vadd.f32 %v187_v26, %v1914_v19 }
  0xf8   :  { %v189_v28 = vpop.f32.mrf.mxu0 }
  0xf9   :  { %214 = vst.msk [vmem:[#allocation2 + $0x48] sm:$0xff] %vm205_vm1, %v188_v27  ;;  %v2036_v29 = vadd.f32 %v189_v28, %v1912_v18 }
  0xfa   :  { %v191_v30 = vpop.f32.mrf.mxu0 }
  0xfb   :  { %v192_v31 = vadd.f32 %v191_v30, %v1914_v19  ;;  %v522_v30 = vld [vmem:[#allocation2 + $0x18] sm:$0xff] }
  0xfc   :  { %v195_v32 = vpop.f32.mrf.mxu0 }
  0xfd   :  { %216 = vst.msk [vmem:[#allocation2 + $0x58] sm:$0xff] %vm205_vm1, %v192_v31  ;;  %v2041_v33 = vadd.f32 %v195_v32, %v1912_v18 }
  0xfe   :  { %v197_v34 = vpop.f32.mrf.mxu0 }
 0x104   :  { %v1627_v35 = vpop.eup %1626 }
 0x105   :  { %v319_v36 = vadd.f32 1.0, %v1627_v35  ;;  %v198_v35 = vadd.f32 %v197_v34, %v1914_v19 }
 0x107   :  { %1628 = vrcp.f32 %v319_v36  ;;  %v199_v36 = vpop.f32.mrf.mxu0  ;;  %218 = vst.msk [vmem:[#allocation2 + $0x68] sm:$0xff] %vm205_vm1, %v198_v35 }
 0x114   :  { %v1930_v39 = vpop.eup %1628 }
 0x115   :  { %v329_v40 = vmul.f32 %v1930_v39, %v328_v38  ;;  %v200_v38 = vadd.f32 %v199_v36, %v1912_v18 }
 0x117   :  { %v330_v42 = vadd.f32 %v329_v40, %v222_v41  ;;  %219 = vst [vmem:[#allocation2 + $0x70] sm:$0xff] %v200_v38 }
 0x119   :  { %1630 = vtanh.f32 %v330_v42 }
 0x126   :  { %v1960_v51 = vpop.eup %1630 }
 0x127   :  { %v332_v53 = vsub.f32 0.0, %v1960_v51 }
 0x129   :  { %334 = vrot.lane.b32.xlu0 %v332_v53, %s1799_s16 }
 0x19b   :  { %v335_v0 = vpop.permute.xlu0 %334 }
 0x19c   :  { %v337_v2 = vmul.f32 %v1930_v39, %v335_v0  ;;  %v201_v39 = vpop.f32.mrf.mxu0 }
 0x19d   :  { %v202_v40 = vadd.f32 %v201_v39, %v1914_v19  ;;  %v2073_v19 = vld [vmem:[%s2367_s7] ss:$0 sm:$0xff] }
 0x19e   :  { %339 = vrot.lane.b32.xlu0 %v337_v2, %s1799_s16 }
 0x19f   :  { %220 = vst.msk [vmem:[#allocation2 + $0x78] sm:$0xff] %vm205_vm1, %v202_v40 }
 0x210   :  { %v340_v41 = vpop.permute.xlu0 %339 }
 0x211   :  { %v342_v42 = vadd.f32 %v1960_v51, %v340_v41 }
 0x213   :  { %v1566_v45 = vpack.c.bf16 %v342_v42, %v342_v42 }
 0x215   :  { %1567 = vmatmul.mubr.msk.bf16.vlgmr.msra.gmra.mxu0 %vm1565_vm2, %v1566_v45 }
 0x216   :  { %536 = vmatpush1.bf16.msra.mxu0 %v1874_v5  ;;  %559 = vmatprep.mubr.bf16.mxu0 %v1798_v1 }
 0x217   :  { %537 = vmatprep.subr.bf16.mxu0 %v1881_v7 }
 0x21a   :  { %538 = vmatpush1.bf16.msra.mxu0 %v1883_v8 }
 0x21b   :  { %539 = vmatprep.subr.bf16.mxu0 %v1885_v9 }
 0x21e   :  { %540 = vmatpush1.bf16.msra.mxu0 %v1889_v10 }
 0x21f   :  { %541 = vmatprep.subr.bf16.mxu0 %v1891_v11 }
 0x222   :  { %542 = vmatpush1.bf16.msra.mxu0 %v1896_v12 }
 0x223   :  { %675 = vmatprep.subr.bf16.mxu0 %v1869_v3 }
 0x225   :  { %1570 = vmatmul.mubr.msk.bf16.vlgmr.msra.gmra.mxu0 %vm205_vm1, %v1566_v45 }
 0x226   :  { %676 = vmatpush1.bf16.msra.mxu0 %v1874_v5  ;;  %699 = vmatprep.mubr.bf16.mxu0 %v1798_v1 }
 0x227   :  { %677 = vmatprep.subr.bf16.mxu0 %v1881_v7 }
 0x22a   :  { %678 = vmatpush1.bf16.msra.mxu0 %v1883_v8 }
 0x22b   :  { %679 = vmatprep.subr.bf16.mxu0 %v1885_v9 }
 0x22e   :  { %680 = vmatpush1.bf16.msra.mxu0 %v1889_v10 }
 0x22f   :  { %681 = vmatprep.subr.bf16.mxu0 %v1891_v11 }
 0x232   :  { %682 = vmatpush1.bf16.msra.mxu0 %v1896_v12 }
 0x233   :  { %735 = vmatprep.subr.bf16.mxu0 %v1933_v43 }
 0x2d5   :  { %v475_v18 = vpop.f32.mrf.mxu0 }
 0x2d7   :  { %v477_v49 = vpop.f32.mrf.mxu0 }
 0x2d8   :  { %v502_v51 = vadd.f32 %v2073_v19, %v477_v49 }
 0x2d9   :  { %v479_v53 = vpop.f32.mrf.mxu0 }
 0x2da   :  { %504 = vrot.lane.b32.xlu1 %v502_v51, %s1799_s16 }
 0x2db   :  { %v480_v56 = vpop.f32.mrf.mxu0 }
 0x2e5   :  { %v561_v0 = vpop.f32.mrf.mxu0 }
 0x2e6   :  { %v568_v2 = vadd.f32 %v561_v0, %v1920_v25  ;;  %v2082_v25 = vld [vmem:[%s2366_s6] ss:$0 sm:$0xff] }
 0x2e7   :  { %v563_v4 = vpop.f32.mrf.mxu0  ;;  %v489_v35 = vadd.f32 %v2082_v25, %v475_v18 }
 0x2e8   :  { %v569_v13 = vsub.f32 0.0, %v568_v2  ;;  %v574_v26 = vadd.f32 %v1927_v37, %v563_v4 }
 0x2e9   :  { %v565_v16 = vpop.f32.mrf.mxu0  ;;  %v490_v36 = vsub.f32 0.0, %v489_v35 }
 0x2ea   :  { %v570_v17 = vmul.f32 1.442695, %v569_v13 }
 0x2eb   :  { %v566_v21 = vpop.f32.mrf.mxu0  ;;  %v491_v38 = vmul.f32 1.442695, %v490_v36 }
 0x2ec   :  { %1632 = vpow2.f32 %v570_v17 }
 0x2f9   :  { %v1633_v22 = vpop.eup %1632 }
 0x2fa   :  { %v572_v23 = vadd.f32 1.0, %v1633_v22 }
 0x2fc   :  { %1634 = vrcp.f32 %v572_v23 }
 0x309   :  { %v1635_v27 = vpop.eup %1634 }
 0x30a   :  { %v575_v28 = vmul.f32 %v1635_v27, %v574_v26 }
 0x30c   :  { %v576_v31 = vadd.f32 %v575_v28, %v522_v30 }
 0x30e   :  { %1636 = vtanh.f32 %v576_v31 }
 0x30f   :  { %1638 = vpow2.f32 %v491_v38 }
 0x31b   :  { %v1637_v32 = vpop.eup %1636 }
 0x31c   :  { %v578_v34 = vsub.f32 %v342_v42, %v1637_v32  ;;  %v1639_v39 = vpop.eup %1638 }
 0x31d   :  { %v493_v40 = vadd.f32 1.0, %v1639_v39 }
 0x31e   :  { %580 = vrot.lane.b32.xlu0 %v578_v34, %s1799_s16 }
 0x31f   :  { %1640 = vrcp.f32 %v493_v40 }
 0x32c   :  { %v1641_v41 = vpop.eup %1640 }
 0x34c   :  { %v505_v45 = vpop.permute.xlu1 %504 }
 0x34d   :  { %v507_v49 = vmul.f32 %v1641_v41, %v505_v45  ;;  %v662_v45 = vld [vmem:[#allocation2 + $0x28] sm:$0xff] }
 0x34f   :  { %v508_v53 = vadd.f32 %v507_v49, %v502_v51 }
 0x351   :  { %1642 = vtanh.f32 %v508_v53 }
 0x35e   :  { %v1643_v56 = vpop.eup %1642 }
 0x35f   :  { %v510_v0 = vsub.f32 0.0, %v1643_v56 }
 0x361   :  { %512 = vrot.lane.b32.xlu1 %v510_v0, %s1799_s16 }
 0x390   :  { %v581_v42 = vpop.permute.xlu0 %580 }
 0x391   :  { %v583_v2 = vmul.f32 %v1635_v27, %v581_v42 }
 0x393   :  { %585 = vrot.lane.b32.xlu0 %v583_v2, %s1799_s16 }
 0x3d3   :  { %v513_v18 = vpop.permute.xlu1 %512 }
 0x3d4   :  { %v515_v4 = vmul.f32 %v1641_v41, %v513_v18 }
 0x3d6   :  { %517 = vrot.lane.b32.xlu1 %v515_v4, %s1799_s16 }
 0x405   :  { %v586_v13 = vpop.permute.xlu0 %585 }
 0x406   :  { %v588_v16 = vadd.f32 %v1637_v32, %v586_v13 }
 0x408   :  { %v663_v17 = vpack.c.bf16 %v588_v16, %v588_v16 }
 0x40a   :  { %1571 = vmatmul.mubr.msk.bf16.vlgmr.msra.gmra.mxu0 %vm205_vm1, %v663_v17 }
 0x40b   :  { %736 = vmatpush1.bf16.msra.mxu0 %v1935_v44  ;;  %767 = vmatprep.mubr.bf16.mxu0 %v1798_v1 }
 0x40c   :  { %737 = vmatprep.subr.bf16.mxu0 %v1940_v46 }
 0x40f   :  { %738 = vmatpush1.bf16.msra.mxu0 %v1945_v47 }
 0x410   :  { %739 = vmatprep.subr.bf16.mxu0 %v1949_v48 }
 0x413   :  { %740 = vmatpush1.bf16.msra.mxu0 %v1958_v50 }
 0x414   :  { %741 = vmatprep.subr.bf16.mxu0 %v1963_v52 }
 0x417   :  { %742 = vmatpush1.bf16.msra.mxu0 %v1971_v54 }
 0x418   :  { %743 = vmatprep.subr.bf16.mxu0 %v1974_v55 }
 0x41b   :  { %744 = vmatpush1.bf16.msra.mxu0 %v1983_v57 }
 0x41c   :  { %745 = vmatprep.subr.bf16.mxu0 %v1986_v58 }
 0x41f   :  { %746 = vmatpush1.bf16.msra.mxu0 %v1992_v59 }
 0x420   :  { %747 = vmatprep.subr.bf16.mxu0 %v1996_v60 }
 0x423   :  { %748 = vmatpush1.bf16.msra.mxu0 %v2001_v61 }
 0x424   :  { %749 = vmatprep.subr.bf16.mxu0 %v2004_v62 }
 0x427   :  { %750 = vmatpush1.bf16.msra.mxu0 %v2012_v63 }
 0x428   :  { %955 = vmatprep.subr.bf16.mxu0 %v1869_v3 }
 0x448   :  { %v518_v51 = vpop.permute.xlu1 %517 }
 0x449   :  { %v520_v21 = vadd.f32 %v1643_v56, %v518_v51 }
 0x44b   :  { %590 = vrot.lane.b32.xlu1 %v520_v21, %s1799_s16 }
 0x4bd   :  { %v591_v22 = vpop.permute.xlu1 %590 }
 0x4be   :  { %v593_v23 = vsel %vm205_vm1, %v588_v16, %v591_v22 }
 0x4bf   :  { %v594_v26 = vpack.c.bf16 %v593_v23, %v593_v23 }
 0x4c1   :  { %628 = vmatmul.mubr.bf16.vlgmr.msra.gmra.mxu1 %v594_v26 }
 0x4c2   :  { %816 = vmatpush1.bf16.msra.mxu1 %v1874_v5  ;;  %839 = vmatprep.mubr.bf16.mxu1 %v1798_v1 }
 0x4c3   :  { %817 = vmatprep.subr.bf16.mxu1 %v1881_v7 }
 0x4c6   :  { %818 = vmatpush1.bf16.msra.mxu1 %v1883_v8 }
 0x4c7   :  { %819 = vmatprep.subr.bf16.mxu1 %v1885_v9 }
 0x4ca   :  { %820 = vmatpush1.bf16.msra.mxu1 %v1889_v10  ;;  %v701_v27 = vpop.f32.mrf.mxu0 }
 0x4cb   :  { %821 = vmatprep.subr.bf16.mxu1 %v1891_v11  ;;  %v708_v32 = vadd.f32 %v701_v27, %v2021_v6 }
 0x4cc   :  { %v703_v28 = vpop.f32.mrf.mxu0 }
 0x4cd   :  { %v709_v34 = vsub.f32 0.0, %v708_v32  ;;  %v714_v40 = vadd.f32 %v1927_v37, %v703_v28 }
 0x4ce   :  { %822 = vmatpush1.bf16.msra.mxu1 %v1896_v12  ;;  %v705_v30 = vpop.f32.mrf.mxu0 }
 0x4cf   :  { %875 = vmatprep.subr.bf16.mxu1 %v1933_v43  ;;  %v710_v35 = vmul.f32 1.442695, %v709_v34 }
 0x4d0   :  { %v706_v31 = vpop.f32.mrf.mxu0 }
 0x4d1   :  { %1644 = vpow2.f32 %v710_v35 }
 0x4de   :  { %v1645_v36 = vpop.eup %1644 }
 0x4df   :  { %v712_v38 = vadd.f32 1.0, %v1645_v36 }
 0x4e1   :  { %1646 = vrcp.f32 %v712_v38 }
 0x4ee   :  { %v1647_v39 = vpop.eup %1646 }
 0x4ef   :  { %v715_v41 = vmul.f32 %v1647_v39, %v714_v40 }
 0x4f1   :  { %v716_v49 = vadd.f32 %v715_v41, %v662_v45 }
 0x4f3   :  { %1648 = vtanh.f32 %v716_v49 }
 0x500   :  { %v1649_v42 = vpop.eup %1648 }
 0x501   :  { %v718_v18 = vsub.f32 %v588_v16, %v1649_v42 }
 0x581   :  { %v629_v53 = vpop.f32.mrf.mxu1 }
 0x582   :  { %v636_v4 = vadd.f32 %v2082_v25, %v629_v53 }
 0x583   :  { %v631_v56 = vpop.f32.mrf.mxu1 }
 0x584   :  { %v642_v0 = vadd.f32 %v2073_v19, %v631_v56  ;;  %v637_v13 = vsub.f32 0.0, %v636_v4 }
 0x585   :  { %v633_v2 = vpop.f32.mrf.mxu1 }
 0x586   :  { %644 = vrot.lane.b32.xlu0 %v642_v0, %s1799_s16  ;;  %v638_v17 = vmul.f32 1.442695, %v637_v13 }
 0x587   :  { %v634_v6 = vpop.f32.mrf.mxu1 }
 0x588   :  { %1650 = vpow2.f32 %v638_v17 }
 0x58a   :  { %720 = vrot.lane.b32.xlu0 %v718_v18, %s1799_s16 }
 0x595   :  { %v1651_v51 = vpop.eup %1650 }
 0x596   :  { %v640_v22 = vadd.f32 1.0, %v1651_v51 }
 0x598   :  { %1652 = vrcp.f32 %v640_v22 }
 0x5a5   :  { %v1653_v23 = vpop.eup %1652 }
 0x5f8   :  { %v645_v26 = vpop.permute.xlu0 %644 }
 0x5f9   :  { %v647_v27 = vmul.f32 %v1653_v23, %v645_v26 }
 0x5fb   :  { %v648_v28 = vadd.f32 %v647_v27, %v642_v0 }
 0x5fc   :  { %v721_v30 = vpop.permute.xlu0 %720 }
 0x5fd   :  { %1654 = vtanh.f32 %v648_v28  ;;  %v723_v31 = vmul.f32 %v1647_v39, %v721_v30 }
 0x5ff   :  { %725 = vrot.lane.b32.xlu0 %v723_v31, %s1799_s16 }
 0x60a   :  { %v1655_v16 = vpop.eup %1654 }
 0x60b   :  { %v650_v32 = vsub.f32 %v520_v21, %v1655_v16 }
 0x60d   :  { %652 = vrot.lane.b32.xlu1 %v650_v32, %s1799_s16 }
 0x671   :  { %v726_v34 = vpop.permute.xlu0 %725 }
 0x672   :  { %v2126_v35 = vadd.f32 %v1649_v42, %v726_v34 }
 0x674   :  { %v803_v36 = vpack.c.bf16 %v2126_v35, %v2126_v35 }
 0x676   :  { %1572 = vmatmul.mubr.msk.bf16.vlgmr.msra.gmra.mxu1 %vm205_vm1, %v803_v36 }
 0x677   :  { %876 = vmatpush1.bf16.msra.mxu1 %v1935_v44  ;;  %907 = vmatprep.mubr.bf16.mxu1 %v1798_v1 }
 0x678   :  { %877 = vmatprep.subr.bf16.mxu1 %v1940_v46 }
 0x67b   :  { %878 = vmatpush1.bf16.msra.mxu1 %v1945_v47 }
 0x67c   :  { %879 = vmatprep.subr.bf16.mxu1 %v1949_v48 }
 0x67f   :  { %v653_v21 = vpop.permute.xlu1 %652  ;;  %880 = vmatpush1.bf16.msra.mxu1 %v1958_v50 }
 0x680   :  { %v655_v38 = vmul.f32 %v1653_v23, %v653_v21  ;;  %881 = vmatprep.subr.bf16.mxu1 %v1963_v52  ;;  %v802_v23 = vld [vmem:[#allocation2 + $0x38] sm:$0xff] }
 0x682   :  { %657 = vrot.lane.b32.xlu1 %v655_v38, %s1799_s16 }
 0x683   :  { %882 = vmatpush1.bf16.msra.mxu1 %v1971_v54 }
 0x684   :  { %883 = vmatprep.subr.bf16.mxu1 %v1974_v55 }
 0x687   :  { %884 = vmatpush1.bf16.msra.mxu1 %v1983_v57 }
 0x688   :  { %885 = vmatprep.subr.bf16.mxu1 %v1986_v58 }
 0x68b   :  { %886 = vmatpush1.bf16.msra.mxu1 %v1992_v59 }
 0x68c   :  { %887 = vmatprep.subr.bf16.mxu1 %v1996_v60 }
 0x68f   :  { %888 = vmatpush1.bf16.msra.mxu1 %v2001_v61 }
 0x690   :  { %889 = vmatprep.subr.bf16.mxu1 %v2004_v62 }
 0x693   :  { %890 = vmatpush1.bf16.msra.mxu1 %v2012_v63 }
 0x694   :  { %1095 = vmatprep.subr.bf16.mxu1 %v1869_v3 }
 0x6f4   :  { %v658_v39 = vpop.permute.xlu1 %657 }
 0x6f5   :  { %v660_v40 = vadd.f32 %v1655_v16, %v658_v39 }
 0x6f7   :  { %730 = vrot.lane.b32.xlu1 %v660_v40, %s1799_s16 }
 0x736   :  { %v841_v41 = vpop.f32.mrf.mxu1 }
 0x737   :  { %v848_v2 = vadd.f32 %v841_v41, %v2026_v20 }
 0x738   :  { %v843_v45 = vpop.f32.mrf.mxu1 }
 0x739   :  { %v849_v6 = vsub.f32 0.0, %v848_v2  ;;  %v854_v51 = vadd.f32 %v1927_v37, %v843_v45 }
 0x73a   :  { %v845_v49 = vpop.f32.mrf.mxu1 }
 0x73b   :  { %v850_v18 = vmul.f32 1.442695, %v849_v6 }
 0x73c   :  { %v846_v53 = vpop.f32.mrf.mxu1 }
 0x73d   :  { %1656 = vpow2.f32 %v850_v18 }
 0x74a   :  { %v1657_v4 = vpop.eup %1656 }
 0x74b   :  { %v852_v13 = vadd.f32 1.0, %v1657_v4 }
 0x74d   :  { %1658 = vrcp.f32 %v852_v13 }
 0x75a   :  { %v1659_v17 = vpop.eup %1658 }
 0x75b   :  { %v855_v22 = vmul.f32 %v1659_v17, %v854_v51 }
 0x75d   :  { %v856_v26 = vadd.f32 %v855_v22, %v802_v23 }
 0x75f   :  { %1660 = vtanh.f32 %v856_v26 }
 0x769   :  { %v731_v56 = vpop.permute.xlu1 %730 }
 0x76a   :  { %v733_v0 = vsel %vm205_vm1, %v2126_v35, %v731_v56 }
 0x76b   :  { %v734_v42 = vpack.c.bf16 %v733_v0, %v733_v0 }
 0x76c   :  { %v1661_v31 = vpop.eup %1660 }
 0x76d   :  { %768 = vmatmul.mubr.bf16.vlgmr.msra.gmra.mxu0 %v734_v42  ;;  %v858_v32 = vsub.f32 %v2126_v35, %v1661_v31 }
 0x76e   :  { %956 = vmatpush1.bf16.msra.mxu0 %v1874_v5  ;;  %979 = vmatprep.mubr.bf16.mxu0 %v1798_v1 }
 0x76f   :  { %957 = vmatprep.subr.bf16.mxu0 %v1881_v7 }
 0x772   :  { %958 = vmatpush1.bf16.msra.mxu0 %v1883_v8 }
 0x773   :  { %959 = vmatprep.subr.bf16.mxu0 %v1885_v9 }
 0x776   :  { %960 = vmatpush1.bf16.msra.mxu0 %v1889_v10 }
 0x777   :  { %961 = vmatprep.subr.bf16.mxu0 %v1891_v11 }
 0x77a   :  { %962 = vmatpush1.bf16.msra.mxu0 %v1896_v12 }
 0x77b   :  { %1015 = vmatprep.subr.bf16.mxu0 %v1933_v43 }
 0x82d   :  { %v769_v27 = vpop.f32.mrf.mxu0 }
 0x82e   :  { %v776_v34 = vadd.f32 %v2082_v25, %v769_v27 }
 0x82f   :  { %v771_v28 = vpop.f32.mrf.mxu0 }
 0x830   :  { %v782_v30 = vadd.f32 %v2073_v19, %v771_v28  ;;  %v777_v36 = vsub.f32 0.0, %v776_v34 }
 0x831   :  { %v773_v16 = vpop.f32.mrf.mxu0 }
 0x832   :  { %784 = vrot.lane.b32.xlu0 %v782_v30, %s1799_s16  ;;  %v778_v21 = vmul.f32 1.442695, %v777_v36 }
 0x833   :  { %v774_v20 = vpop.f32.mrf.mxu0 }
 0x834   :  { %1662 = vpow2.f32 %v778_v21 }
 0x836   :  { %860 = vrot.lane.b32.xlu0 %v858_v32, %s1799_s16  ;;  %v942_v32 = vld [vmem:[#allocation2 + $0x48] sm:$0xff] }
 0x841   :  { %v1663_v38 = vpop.eup %1662 }
 0x842   :  { %v780_v39 = vadd.f32 1.0, %v1663_v38 }
 0x844   :  { %1664 = vrcp.f32 %v780_v39 }
 0x851   :  { %v1665_v41 = vpop.eup %1664 }
 0x8a4   :  { %v785_v45 = vpop.permute.xlu0 %784 }
 0x8a5   :  { %v787_v49 = vmul.f32 %v1665_v41, %v785_v45 }
 0x8a7   :  { %v788_v53 = vadd.f32 %v787_v49, %v782_v30 }
 0x8a8   :  { %v861_v56 = vpop.permute.xlu0 %860 }
 0x8a9   :  { %1666 = vtanh.f32 %v788_v53  ;;  %v863_v0 = vmul.f32 %v1659_v17, %v861_v56 }
 0x8ab   :  { %865 = vrot.lane.b32.xlu0 %v863_v0, %s1799_s16 }
 0x8b6   :  { %v1667_v35 = vpop.eup %1666 }
 0x8b7   :  { %v790_v42 = vsub.f32 %v660_v40, %v1667_v35 }
 0x8b9   :  { %792 = vrot.lane.b32.xlu1 %v790_v42, %s1799_s16 }
 0x91d   :  { %v866_v2 = vpop.permute.xlu0 %865 }
 0x91e   :  { %v2170_v6 = vadd.f32 %v1661_v31, %v866_v2 }
 0x920   :  { %v943_v18 = vpack.c.bf16 %v2170_v6, %v2170_v6 }
 0x922   :  { %1573 = vmatmul.mubr.msk.bf16.vlgmr.msra.gmra.mxu0 %vm205_vm1, %v943_v18 }
 0x923   :  { %1016 = vmatpush1.bf16.msra.mxu0 %v1935_v44  ;;  %1047 = vmatprep.mubr.bf16.mxu0 %v1798_v1 }
 0x924   :  { %1017 = vmatprep.subr.bf16.mxu0 %v1940_v46 }
 0x927   :  { %1018 = vmatpush1.bf16.msra.mxu0 %v1945_v47 }
 0x928   :  { %1019 = vmatprep.subr.bf16.mxu0 %v1949_v48 }
 0x92b   :  { %v793_v40 = vpop.permute.xlu1 %792  ;;  %1020 = vmatpush1.bf16.msra.mxu0 %v1958_v50 }
 0x92c   :  { %v795_v4 = vmul.f32 %v1665_v41, %v793_v40  ;;  %1021 = vmatprep.subr.bf16.mxu0 %v1963_v52 }
 0x92e   :  { %797 = vrot.lane.b32.xlu1 %v795_v4, %s1799_s16 }
 0x92f   :  { %1022 = vmatpush1.bf16.msra.mxu0 %v1971_v54 }
 0x930   :  { %1023 = vmatprep.subr.bf16.mxu0 %v1974_v55 }
 0x933   :  { %1024 = vmatpush1.bf16.msra.mxu0 %v1983_v57 }
 0x934   :  { %1025 = vmatprep.subr.bf16.mxu0 %v1986_v58 }
 0x937   :  { %1026 = vmatpush1.bf16.msra.mxu0 %v1992_v59 }
 0x938   :  { %1027 = vmatprep.subr.bf16.mxu0 %v1996_v60 }
 0x93b   :  { %1028 = vmatpush1.bf16.msra.mxu0 %v2001_v61 }
 0x93c   :  { %1029 = vmatprep.subr.bf16.mxu0 %v2004_v62 }
 0x93f   :  { %1030 = vmatpush1.bf16.msra.mxu0 %v2012_v63 }
 0x940   :  { %1235 = vmatprep.subr.bf16.mxu0 %v1869_v3 }
 0x9a0   :  { %v798_v13 = vpop.permute.xlu1 %797 }
 0x9a1   :  { %v800_v17 = vadd.f32 %v1667_v35, %v798_v13 }
 0x9a3   :  { %870 = vrot.lane.b32.xlu1 %v800_v17, %s1799_s16 }
 0x9e2   :  { %v981_v51 = vpop.f32.mrf.mxu0 }
 0x9e3   :  { %v988_v3 = vadd.f32 %v981_v51, %v2031_v24 }
 0x9e4   :  { %v983_v22 = vpop.f32.mrf.mxu0 }
 0x9e5   :  { %v989_v31 = vsub.f32 0.0, %v988_v3 }
 0x9e6   :  { %v985_v23 = vpop.f32.mrf.mxu0 }
 0x9e7   :  { %v1722_v23 = vld [vmem:[#allocation4 + $0x34] ss:$8 sps:$4 sm:$0xff]  }
 0x9e8   :  { %v986_v26 = vpop.f32.mrf.mxu0 }
 0xa15   :  { %v871_v27 = vpop.permute.xlu1 %870 }
 0xa16   :  { %v873_v28 = vsel %vm205_vm1, %v2170_v6, %v871_v27 }
 0xa17   :  { %v874_v30 = vpack.c.bf16 %v873_v28, %v873_v28 }
 0xa19   :  { %908 = vmatmul.mubr.bf16.vlgmr.msra.gmra.mxu1 %v874_v30 }
 0xa1a   :  { %1096 = vmatpush1.bf16.msra.mxu1 %v1874_v5  ;;  %1119 = vmatprep.mubr.bf16.mxu1 %v1798_v1  ;;  %v990_v5 = vmul.f32 1.442695, %v989_v31 }
 0xa1b   :  { %1097 = vmatprep.subr.bf16.mxu1 %v1881_v7 }
 0xa1c   :  { %1668 = vpow2.f32 %v990_v5 }
 0xa1e   :  { %1098 = vmatpush1.bf16.msra.mxu1 %v1883_v8  ;;  %v994_v8 = vadd.f32 %v1927_v37, %v983_v22 }
 0xa1f   :  { %1099 = vmatprep.subr.bf16.mxu1 %v1885_v9 }
 0xa22   :  { %1100 = vmatpush1.bf16.msra.mxu1 %v1889_v10 }
 0xa23   :  { %1101 = vmatprep.subr.bf16.mxu1 %v1891_v11 }
 0xa26   :  { %1102 = vmatpush1.bf16.msra.mxu1 %v1896_v12 }
 0xa27   :  { %1155 = vmatprep.subr.bf16.mxu1 %v1933_v43 }
 0xa29   :  { %v1669_v16 = vpop.eup %1668 }
 0xa2a   :  { %v992_v20 = vadd.f32 1.0, %v1669_v16 }
 0xa2c   :  { %1670 = vrcp.f32 %v992_v20 }
 0xa39   :  { %v1671_v7 = vpop.eup %1670 }
 0xa3a   :  { %v995_v9 = vmul.f32 %v1671_v7, %v994_v8  ;;  %v2246_v8 = vld [vmem:[#allocation4 + $0x24] ss:$8 sps:$4 sm:$0xff]  }
 0xa3c   :  { %v996_v10 = vadd.f32 %v995_v9, %v942_v32  ;;  %v2249_v9 = vld [vmem:[#allocation4 + $0x20] ss:$8 sps:$4 sm:$0xff]   ;;  %v2252_v32 = vld [vmem:[#allocation4 + $0x14] ss:$8 sps:$4 sm:$0xff]  }
 0xa3e   :  { %1672 = vtanh.f32 %v996_v10  ;;  %v2255_v10 = vld [vmem:[#allocation4 + $0x10] ss:$8 sps:$4 sm:$0xff]  }
 0xa4b   :  { %v1673_v36 = vpop.eup %1672 }
 0xa4c   :  { %v998_v38 = vsub.f32 %v2170_v6, %v1673_v36 }
 0xad9   :  { %v909_v11 = vpop.f32.mrf.mxu1 }
 0xada   :  { %v916_v39 = vadd.f32 %v2082_v25, %v909_v11  ;;  %v2258_v11 = vld [vmem:[#allocation4 + $0x4] ss:$8 sps:$4 sm:$0xff]  }
 0xadb   :  { %v911_v34 = vpop.f32.mrf.mxu1 }
 0xadc   :  { %v922_v12 = vadd.f32 %v2073_v19, %v911_v34  ;;  %v917_v41 = vsub.f32 0.0, %v916_v39  ;;  %v2261_v34 = vld [vmem:[#allocation4] ss:$8 sps:$4 sm:$0xff]  }
 0xadd   :  { %v913_v21 = vpop.f32.mrf.mxu1 }
 0xade   :  { %924 = vrot.lane.b32.xlu0 %v922_v12, %s1799_s16  ;;  %v918_v45 = vmul.f32 1.442695, %v917_v41 }
 0xadf   :  { %v914_v24 = vpop.f32.mrf.mxu1 }
 0xae0   :  { %1674 = vpow2.f32 %v918_v45 }
 0xae2   :  { %1000 = vrot.lane.b32.xlu0 %v998_v38, %s1799_s16 }
 0xaed   :  { %v1675_v49 = vpop.eup %1674 }
 0xaee   :  { %v920_v53 = vadd.f32 1.0, %v1675_v49  ;;  %v1082_v49 = vld [vmem:[#allocation2 + $0x58] sm:$0xff] }
 0xaf0   :  { %1676 = vrcp.f32 %v920_v53 }
 0xafd   :  { %v1677_v56 = vpop.eup %1676 }
 0xb50   :  { %v925_v0 = vpop.permute.xlu0 %924 }
 0xb51   :  { %v927_v35 = vmul.f32 %v1677_v56, %v925_v0 }
 0xb53   :  { %v928_v42 = vadd.f32 %v927_v35, %v922_v12 }
 0xb54   :  { %v1001_v2 = vpop.permute.xlu0 %1000 }
 0xb55   :  { %1678 = vtanh.f32 %v928_v42  ;;  %v1003_v18 = vmul.f32 %v1671_v7, %v1001_v2  ;;  %v2242_v7 = vld [vmem:[#allocation4 + $0x30] ss:$8 sps:$4 sm:$0xff]  }
 0xb57   :  { %1005 = vrot.lane.b32.xlu0 %v1003_v18, %s1799_s16 }
 0xb62   :  { %v1679_v6 = vpop.eup %1678 }
 0xb63   :  { %v930_v40 = vsub.f32 %v800_v17, %v1679_v6 }
 0xb65   :  { %932 = vrot.lane.b32.xlu1 %v930_v40, %s1799_s16 }
 0xbc9   :  { %v1006_v4 = vpop.permute.xlu0 %1005 }
 0xbca   :  { %v2214_v13 = vadd.f32 %v1673_v36, %v1006_v4 }
 0xbcc   :  { %v1083_v51 = vpack.c.bf16 %v2214_v13, %v2214_v13 }
 0xbce   :  { %1574 = vmatmul.mubr.msk.bf16.vlgmr.msra.gmra.mxu1 %vm205_vm1, %v1083_v51 }
 0xbcf   :  { %1156 = vmatpush1.bf16.msra.mxu1 %v1935_v44  ;;  %1187 = vmatprep.mubr.bf16.mxu1 %v1798_v1 }
 0xbd0   :  { %1157 = vmatprep.subr.bf16.mxu1 %v1940_v46 }
 0xbd3   :  { %1158 = vmatpush1.bf16.msra.mxu1 %v1945_v47 }
 0xbd4   :  { %1159 = vmatprep.subr.bf16.mxu1 %v1949_v48 }
 0xbd7   :  { %v933_v17 = vpop.permute.xlu1 %932  ;;  %1160 = vmatpush1.bf16.msra.mxu1 %v1958_v50 }
 0xbd8   :  { %v935_v22 = vmul.f32 %v1677_v56, %v933_v17  ;;  %1161 = vmatprep.subr.bf16.mxu1 %v1963_v52 }
 0xbda   :  { %937 = vrot.lane.b32.xlu1 %v935_v22, %s1799_s16 }
 0xbdb   :  { %1162 = vmatpush1.bf16.msra.mxu1 %v1971_v54 }
 0xbdc   :  { %1163 = vmatprep.subr.bf16.mxu1 %v1974_v55 }
 0xbdf   :  { %1164 = vmatpush1.bf16.msra.mxu1 %v1983_v57 }
 0xbe0   :  { %1165 = vmatprep.subr.bf16.mxu1 %v1986_v58 }
 0xbe3   :  { %1166 = vmatpush1.bf16.msra.mxu1 %v1992_v59 }
 0xbe4   :  { %1167 = vmatprep.subr.bf16.mxu1 %v1996_v60 }
 0xbe7   :  { %1168 = vmatpush1.bf16.msra.mxu1 %v2001_v61 }
 0xbe8   :  { %1169 = vmatprep.subr.bf16.mxu1 %v2004_v62 }
 0xbeb   :  { %1170 = vmatpush1.bf16.msra.mxu1 %v2012_v63 }
 0xbec   :  { %1375 = vmatprep.subr.bf16.mxu1 %v1722_v23 }
 0xc4c   :  { %v938_v26 = vpop.permute.xlu1 %937 }
 0xc4d   :  { %v2236_v27 = vadd.f32 %v1679_v6, %v938_v26 }
 0xc4f   :  { %1010 = vrot.lane.b32.xlu1 %v2236_v27, %s1799_s16 }
 0xc8e   :  { %v1121_v28 = vpop.f32.mrf.mxu1 }
 0xc8f   :  { %v1128_v12 = vadd.f32 %v1121_v28, %v2036_v29 }
 0xc90   :  { %v1123_v30 = vpop.f32.mrf.mxu1 }
 0xc91   :  { %v1129_v36 = vsub.f32 0.0, %v1128_v12  ;;  %v1134_v41 = vadd.f32 %v1927_v37, %v1123_v30 }
 0xc92   :  { %v1125_v3 = vpop.f32.mrf.mxu1 }
 0xc93   :  { %v1130_v21 = vmul.f32 1.442695, %v1129_v36 }
 0xc94   :  { %v1126_v31 = vpop.f32.mrf.mxu1 }
 0xc95   :  { %1680 = vpow2.f32 %v1130_v21 }
 0xca2   :  { %v1681_v24 = vpop.eup %1680 }
 0xca3   :  { %v1132_v38 = vadd.f32 1.0, %v1681_v24 }
 0xca5   :  { %1682 = vrcp.f32 %v1132_v38 }
 0xcb2   :  { %v1683_v39 = vpop.eup %1682 }
 0xcb3   :  { %v1135_v45 = vmul.f32 %v1683_v39, %v1134_v41 }
 0xcb5   :  { %v1136_v53 = vadd.f32 %v1135_v45, %v1082_v49 }
 0xcb7   :  { %1684 = vtanh.f32 %v1136_v53 }
 0xcc1   :  { %v1011_v5 = vpop.permute.xlu1 %1010 }
 0xcc2   :  { %v1013_v16 = vsel %vm205_vm1, %v2214_v13, %v1011_v5 }
 0xcc3   :  { %v1014_v20 = vpack.c.bf16 %v1013_v16, %v1013_v16 }
 0xcc5   :  { %1048 = vmatmul.mubr.bf16.vlgmr.msra.gmra.mxu0 %v1014_v20 }
 0xcc6   :  { %1236 = vmatpush1.bf16.msra.mxu0 %v2242_v7  ;;  %1259 = vmatprep.mubr.bf16.mxu0 %v1798_v1 }
 0xcc7   :  { %1237 = vmatprep.subr.bf16.mxu0 %v2246_v8 }
 0xcca   :  { %1238 = vmatpush1.bf16.msra.mxu0 %v2249_v9 }
 0xccb   :  { %1239 = vmatprep.subr.bf16.mxu0 %v2252_v32 }
 0xcce   :  { %1240 = vmatpush1.bf16.msra.mxu0 %v2255_v10 }
 0xccf   :  { %1241 = vmatprep.subr.bf16.mxu0 %v2258_v11 }
 0xcd2   :  { %1242 = vmatpush1.bf16.msra.mxu0 %v2261_v34 }
 0xcd3   :  { %1295 = vmatprep.subr.bf16.mxu0 %v1933_v43  ;;  %v1685_v43 = vpop.eup %1684 }
 0xcd4   :  { %v1138_v2 = vsub.f32 %v2214_v13, %v1685_v43 }
 0xd85   :  { %v1049_v56 = vpop.f32.mrf.mxu0 }
 0xd86   :  { %v1056_v18 = vadd.f32 %v2082_v25, %v1049_v56 }
 0xd87   :  { %v1051_v0 = vpop.f32.mrf.mxu0 }
 0xd88   :  { %v1062_v35 = vadd.f32 %v2073_v19, %v1051_v0  ;;  %v1057_v37 = vsub.f32 0.0, %v1056_v18 }
 0xd89   :  { %v1053_v42 = vpop.f32.mrf.mxu0 }
 0xd8a   :  { %1064 = vrot.lane.b32.xlu0 %v1062_v35, %s1799_s16  ;;  %v1058_v6 = vmul.f32 1.442695, %v1057_v37 }
 0xd8b   :  { %v1054_v29 = vpop.f32.mrf.mxu0 }
 0xd8c   :  { %1686 = vpow2.f32 %v1058_v6  ;;  %v1732_v6 = vld [vmem:[#allocation6 + $0x70] ss:$8 sps:$4 sm:$0xff]  }
 0xd8e   :  { %1140 = vrot.lane.b32.xlu0 %v1138_v2, %s1799_s16 }
 0xd99   :  { %v1687_v40 = vpop.eup %1686 }
 0xd9a   :  { %v1060_v4 = vadd.f32 1.0, %v1687_v40  ;;  %v1733_v40 = vld [vmem:[#allocation6 + $0x64] ss:$8 sps:$4 sm:$0xff]  }
 0xd9c   :  { %1688 = vrcp.f32 %v1060_v4  ;;  %v1734_v4 = vld [vmem:[#allocation6 + $0x60] ss:$8 sps:$4 sm:$0xff]  }
 0xda9   :  { %v1689_v51 = vpop.eup %1688 }
 0xdfc   :  { %v1065_v17 = vpop.permute.xlu0 %1064 }
 0xdfd   :  { %v1067_v22 = vmul.f32 %v1689_v51, %v1065_v17 }
 0xdff   :  { %v1068_v23 = vadd.f32 %v1067_v22, %v1062_v35  ;;  %v1736_v22 = vld [vmem:[#allocation6 + $0x50] ss:$8 sps:$4 sm:$0xff]  }
 0xe00   :  { %v1141_v26 = vpop.permute.xlu0 %1140 }
 0xe01   :  { %1690 = vtanh.f32 %v1068_v23  ;;  %v1143_v28 = vmul.f32 %v1683_v39, %v1141_v26  ;;  %v1737_v26 = vld [vmem:[#allocation6 + $0x44] ss:$8 sps:$4 sm:$0xff]  }
 0xe03   :  { %1145 = vrot.lane.b32.xlu0 %v1143_v28, %s1799_s16  ;;  %v1738_v28 = vld [vmem:[#allocation6 + $0x40] ss:$8 sps:$4 sm:$0xff]  }
 0xe0e   :  { %v1691_v13 = vpop.eup %1690 }
 0xe0f   :  { %v1070_v30 = vsub.f32 %v2236_v27, %v1691_v13 }
 0xe11   :  { %1072 = vrot.lane.b32.xlu1 %v1070_v30, %s1799_s16  ;;  %v1740_v30 = vld [vmem:[#allocation6 + $0x30] ss:$8 sps:$4 sm:$0xff]  }
 0xe75   :  { %v1146_v3 = vpop.permute.xlu0 %1145 }
 0xe76   :  { %v2275_v31 = vadd.f32 %v1685_v43, %v1146_v3  ;;  %v1742_v3 = vld [vmem:[#allocation6 + $0x20] ss:$8 sps:$4 sm:$0xff]  }
 0xe78   :  { %v1223_v5 = vpack.c.bf16 %v2275_v31, %v2275_v31 }
 0xe7a   :  { %1575 = vmatmul.mubr.msk.bf16.vlgmr.msra.gmra.mxu0 %vm205_vm1, %v1223_v5  ;;  %v1744_v5 = vld [vmem:[#allocation6 + $0x10] ss:$8 sps:$4 sm:$0xff]  }
 0xe7b   :  { %1296 = vmatpush1.bf16.msra.mxu0 %v1935_v44  ;;  %1327 = vmatprep.mubr.bf16.mxu0 %v1798_v1 }
 0xe7c   :  { %1297 = vmatprep.subr.bf16.mxu0 %v1940_v46 }
 0xe7f   :  { %1298 = vmatpush1.bf16.msra.mxu0 %v1945_v47 }
 0xe80   :  { %1299 = vmatprep.subr.bf16.mxu0 %v1949_v48 }
 0xe83   :  { %v1073_v27 = vpop.permute.xlu1 %1072  ;;  %1300 = vmatpush1.bf16.msra.mxu0 %v1958_v50 }
 0xe84   :  { %v1075_v16 = vmul.f32 %v1689_v51, %v1073_v27  ;;  %1301 = vmatprep.subr.bf16.mxu0 %v1963_v52  ;;  %v1735_v51 = vld [vmem:[#allocation6 + $0x54] ss:$8 sps:$4 sm:$0xff]   ;;  %v1745_v27 = vld [vmem:[#allocation6 + $0x4] ss:$8 sps:$4 sm:$0xff]  }
 0xe86   :  { %1077 = vrot.lane.b32.xlu1 %v1075_v16, %s1799_s16  ;;  %v1746_v16 = vld [vmem:[#allocation6] ss:$8 sps:$4 sm:$0xff]  }
 0xe87   :  { %1302 = vmatpush1.bf16.msra.mxu0 %v1971_v54 }
 0xe88   :  { %1303 = vmatprep.subr.bf16.mxu0 %v1974_v55 }
 0xe8b   :  { %1304 = vmatpush1.bf16.msra.mxu0 %v1983_v57 }
 0xe8c   :  { %1305 = vmatprep.subr.bf16.mxu0 %v1986_v58  ;;  %v1730_v58 = vld [vmem:[#allocation6 + $0x74] ss:$8 sps:$4 sm:$0xff]  }
 0xe8f   :  { %1306 = vmatpush1.bf16.msra.mxu0 %v1992_v59 }
 0xe90   :  { %1307 = vmatprep.subr.bf16.mxu0 %v1996_v60 }
 0xe93   :  { %1308 = vmatpush1.bf16.msra.mxu0 %v2001_v61 }
 0xe94   :  { %1309 = vmatprep.subr.bf16.mxu0 %v2004_v62 }
 0xe97   :  { %1310 = vmatpush1.bf16.msra.mxu0 %v2012_v63 }
 0xef8   :  { %v1078_v44 = vpop.permute.xlu1 %1077 }
 0xef9   :  { %v1080_v46 = vadd.f32 %v1691_v13, %v1078_v44  ;;  %v1739_v13 = vld [vmem:[#allocation6 + $0x34] ss:$8 sps:$4 sm:$0xff]  }
 0xefb   :  { %1150 = vrot.lane.b32.xlu1 %v1080_v46, %s1799_s16 }
 0xf3a   :  { %v1261_v47 = vpop.f32.mrf.mxu0 }
 0xf3b   :  { %v1268_v59 = vadd.f32 %v1261_v47, %v2041_v33 }
 0xf3c   :  { %v1263_v48 = vpop.f32.mrf.mxu0 }
 0xf3d   :  { %v1269_v60 = vsub.f32 0.0, %v1268_v59 }
 0xf3e   :  { %v1265_v50 = vpop.f32.mrf.mxu0 }
 0xf3f   :  { %v1270_v61 = vmul.f32 1.442695, %v1269_v60 }
 0xf40   :  { %v1266_v52 = vpop.f32.mrf.mxu0 }
 0xf41   :  { %1692 = vpow2.f32 %v1270_v61 }
 0xf4e   :  { %v1693_v62 = vpop.eup %1692 }
 0xf4f   :  { %v1272_v63 = vadd.f32 1.0, %v1693_v62 }
 0xf51   :  { %1694 = vrcp.f32 %v1272_v63 }
 0xf5e   :  { %v1695_v20 = vpop.eup %1694 }
 0xf6d   :  { %v1151_v54 = vpop.permute.xlu1 %1150 }
 0xf6e   :  { %v1153_v55 = vsel %vm205_vm1, %v2275_v31, %v1151_v54 }
 0xf6f   :  { %v1154_v57 = vpack.c.bf16 %v1153_v55, %v1153_v55 }
 0xf71   :  { %1188 = vmatmul.mubr.bf16.vlgmr.msra.gmra.mxu1 %v1154_v57 }
 0xf72   :  { %1376 = vmatpush1.bf16.msra.mxu1 %v2242_v7  ;;  %1399 = vmatprep.mubr.bf16.mxu1 %v1798_v1  ;;  %v2312_v7 = vld [vmem:[%s2365_s5] ss:$0 sm:$0xff] }
 0xf73   :  { %1377 = vmatprep.subr.bf16.mxu1 %v2246_v8  ;;  %v1274_v8 = vadd.f32 %v2312_v7, %v1263_v48 }
 0xf76   :  { %1378 = vmatpush1.bf16.msra.mxu1 %v2249_v9  ;;  %v1275_v9 = vmul.f32 %v1695_v20, %v1274_v8 }
 0xf77   :  { %1379 = vmatprep.subr.bf16.mxu1 %v2252_v32  ;;  %v1222_v32 = vld [vmem:[#allocation2 + $0x68] sm:$0xff] }
 0xf7a   :  { %1380 = vmatpush1.bf16.msra.mxu1 %v2255_v10  ;;  %v1276_v10 = vadd.f32 %v1275_v9, %v1222_v32  ;;  %v1362_v32 = vld [vmem:[#allocation2 + $0x78] sm:$0xff] }
 0xf7b   :  { %1381 = vmatprep.subr.bf16.mxu1 %v2258_v11 }
 0xf7c   :  { %1696 = vtanh.f32 %v1276_v10 }
 0xf7e   :  { %1382 = vmatpush1.bf16.msra.mxu1 %v2261_v34 }
 0xf7f   :  { %1435 = vmatprep.subr.bf16.mxu1 %v1730_v58  ;;  %v1747_v58 = vld [vmem:[#allocation2 + $0x70] sm:$0xff] }
 0xf89   :  { %v1697_v12 = vpop.eup %1696 }
 0xf8a   :  { %v1278_v24 = vsub.f32 %v2275_v31, %v1697_v12  ;;  %v1743_v31 = vld [vmem:[#allocation6 + $0x14] ss:$8 sps:$4 sm:$0xff]  }
0x1031   :  { %v1189_v11 = vpop.f32.mrf.mxu1 }
0x1032   :  { %v1196_v38 = vadd.f32 %v2082_v25, %v1189_v11 }
0x1033   :  { %v1191_v33 = vpop.f32.mrf.mxu1 }
0x1034   :  { %v1202_v34 = vadd.f32 %v2073_v19, %v1191_v33  ;;  %v1197_v39 = vsub.f32 0.0, %v1196_v38 }
0x1035   :  { %v1193_v36 = vpop.f32.mrf.mxu1 }
0x1036   :  { %1204 = vrot.lane.b32.xlu0 %v1202_v34, %s1799_s16  ;;  %v1198_v41 = vmul.f32 1.442695, %v1197_v39 }
0x1037   :  { %v1194_v21 = vpop.f32.mrf.mxu1 }
0x1038   :  { %1698 = vpow2.f32 %v1198_v41 }
0x103a   :  { %1280 = vrot.lane.b32.xlu0 %v1278_v24, %s1799_s16 }
0x1045   :  { %v1699_v45 = vpop.eup %1698 }
0x1046   :  { %v1200_v49 = vadd.f32 1.0, %v1699_v45 }
0x1048   :  { %1700 = vrcp.f32 %v1200_v49 }
0x1055   :  { %v1701_v53 = vpop.eup %1700 }
0x10a8   :  { %v1205_v56 = vpop.permute.xlu0 %1204 }
0x10a9   :  { %v1207_v19 = vmul.f32 %v1701_v53, %v1205_v56 }
0x10ab   :  { %v1208_v0 = vadd.f32 %v1207_v19, %v1202_v34  ;;  %v1748_v34 = vld [vmem:[%s2367_s7] ss:$0 sm:$0xff] }
0x10ac   :  { %v1281_v35 = vpop.permute.xlu0 %1280 }
0x10ad   :  { %1702 = vtanh.f32 %v1208_v0  ;;  %v1283_v43 = vmul.f32 %v1695_v20, %v1281_v35 }
0x10af   :  { %1285 = vrot.lane.b32.xlu0 %v1283_v43, %s1799_s16 }
0x10ba   :  { %v1703_v42 = vpop.eup %1702 }
0x10bb   :  { %v1210_v29 = vsub.f32 %v1080_v46, %v1703_v42 }
0x10bd   :  { %1212 = vrot.lane.b32.xlu1 %v1210_v29, %s1799_s16 }
0x1121   :  { %v1286_v2 = vpop.permute.xlu0 %1285 }
0x1122   :  { %v2322_v18 = vadd.f32 %v1697_v12, %v1286_v2 }
0x1124   :  { %v1363_v37 = vpack.c.bf16 %v2322_v18, %v2322_v18 }
0x1126   :  { %1576 = vmatmul.mubr.msk.bf16.vlgmr.msra.gmra.mxu1 %vm205_vm1, %v1363_v37 }
0x1127   :  { %1436 = vmatpush1.bf16.msra.mxu1 %v1732_v6  ;;  %1467 = vmatprep.mubr.bf16.mxu1 %v1798_v1  ;;  %v1741_v1 = vld [vmem:[#allocation6 + $0x24] ss:$8 sps:$4 sm:$0xff]  }
0x1128   :  { %1437 = vmatprep.subr.bf16.mxu1 %v1733_v40 }
0x112b   :  { %1438 = vmatpush1.bf16.msra.mxu1 %v1734_v4 }
0x112c   :  { %1439 = vmatprep.subr.bf16.mxu1 %v1735_v51 }
0x112f   :  { %v1213_v17 = vpop.permute.xlu1 %1212  ;;  %1440 = vmatpush1.bf16.msra.mxu1 %v1736_v22 }
0x1130   :  { %v1215_v23 = vmul.f32 %v1701_v53, %v1213_v17  ;;  %1441 = vmatprep.subr.bf16.mxu1 %v1737_v26 }
0x1132   :  { %1217 = vrot.lane.b32.xlu1 %v1215_v23, %s1799_s16 }
0x1133   :  { %1442 = vmatpush1.bf16.msra.mxu1 %v1738_v28 }
0x1134   :  { %1443 = vmatprep.subr.bf16.mxu1 %v1739_v13 }
0x1137   :  { %1444 = vmatpush1.bf16.msra.mxu1 %v1740_v30  ;;  %v1749_v30 = vld [vmem:[%s2366_s6] ss:$0 sm:$0xff] }
0x1138   :  { %1445 = vmatprep.subr.bf16.mxu1 %v1741_v1 }
0x113b   :  { %1446 = vmatpush1.bf16.msra.mxu1 %v1742_v3 }
0x113c   :  { %1447 = vmatprep.subr.bf16.mxu1 %v1743_v31 }
0x113f   :  { %1448 = vmatpush1.bf16.msra.mxu1 %v1744_v5 }
0x1140   :  { %1449 = vmatprep.subr.bf16.mxu1 %v1745_v27 }
0x1143   :  { %1450 = vmatpush1.bf16.msra.mxu1 %v1746_v16 }
0x11a4   :  { %v1218_v44 = vpop.permute.xlu1 %1217 }
0x11a5   :  { %v1220_v46 = vadd.f32 %v1703_v42, %v1218_v44 }
0x11a7   :  { %1290 = vrot.lane.b32.xlu1 %v1220_v46, %s1799_s16 }
0x11e6   :  { %v1401_v47 = vpop.f32.mrf.mxu1 }
0x11e7   :  { %v1408_v59 = vadd.f32 %v1747_v58, %v1401_v47 }
0x11e8   :  { %v1403_v48 = vpop.f32.mrf.mxu1 }
0x11e9   :  { %v1409_v60 = vsub.f32 0.0, %v1408_v59  ;;  %v1414_v8 = vadd.f32 %v2312_v7, %v1403_v48 }
0x11ea   :  { %v1405_v50 = vpop.f32.mrf.mxu1 }
0x11eb   :  { %v1410_v61 = vmul.f32 1.442695, %v1409_v60 }
0x11ec   :  { %v1406_v52 = vpop.f32.mrf.mxu1 }
0x11ed   :  { %1704 = vpow2.f32 %v1410_v61 }
0x11fa   :  { %v1705_v62 = vpop.eup %1704 }
0x11fb   :  { %v1412_v63 = vadd.f32 1.0, %v1705_v62 }
0x11fd   :  { %1706 = vrcp.f32 %v1412_v63 }
0x120a   :  { %v1707_v20 = vpop.eup %1706 }
0x120b   :  { %v1415_v9 = vmul.f32 %v1707_v20, %v1414_v8  ;;  %v1510_v8 = vld [vmem:[%s2368_s8] sm:$0x1] }
0x120d   :  { %v1416_v10 = vadd.f32 %v1415_v9, %v1362_v32 }
0x120f   :  { %1708 = vtanh.f32 %v1416_v10 }
0x1219   :  { %v1291_v54 = vpop.permute.xlu1 %1290 }
0x121a   :  { %v1293_v55 = vsel %vm205_vm1, %v2322_v18, %v1291_v54 }
0x121b   :  { %v1294_v57 = vpack.c.bf16 %v1293_v55, %v1293_v55 }
0x121c   :  { %v1709_v36 = vpop.eup %1708 }
0x121d   :  { %1328 = vmatmul.mubr.bf16.vlgmr.msra.gmra.mxu0 %v1294_v57  ;;  %v1418_v38 = vsub.f32 %v2322_v18, %v1709_v36 }
0x12dd   :  { %v1329_v11 = vpop.f32.mrf.mxu0 }
0x12de   :  { %v1336_v7 = vadd.f32 %v2082_v25, %v1329_v11  ;;  %v1516_v11 = vld [vmem:[#allocation3] sm:$0x1] }
0x12df   :  { %v1331_v33 = vpop.f32.mrf.mxu0 }
0x12e0   :  { %v1342_v12 = vadd.f32 %v1748_v34, %v1331_v33  ;;  %v1337_v39 = vsub.f32 0.0, %v1336_v7 }
0x12e1   :  { %v1333_v21 = vpop.f32.mrf.mxu0 }
0x12e2   :  { %1344 = vrot.lane.b32.xlu0 %v1342_v12, %s1799_s16  ;;  %v1338_v41 = vmul.f32 1.442695, %v1337_v39 }
0x12e3   :  { %v1334_v24 = vpop.f32.mrf.mxu0 }
0x12e4   :  { %1710 = vpow2.f32 %v1338_v41 }
0x12e6   :  { %1420 = vrot.lane.b32.xlu0 %v1418_v38, %s1799_s16 }
0x12f1   :  { %v1711_v45 = vpop.eup %1710 }
0x12f2   :  { %v1340_v49 = vadd.f32 1.0, %v1711_v45 }
0x12f4   :  { %1712 = vrcp.f32 %v1340_v49 }
0x1301   :  { %v1713_v53 = vpop.eup %1712 }
0x1354   :  { %v1345_v56 = vpop.permute.xlu0 %1344 }
0x1355   :  { %v1347_v19 = vmul.f32 %v1713_v53, %v1345_v56 }
0x1357   :  { %v1348_v0 = vadd.f32 %v1347_v19, %v1342_v12 }
0x1358   :  { %v1421_v35 = vpop.permute.xlu0 %1420 }
0x1359   :  { %1714 = vtanh.f32 %v1348_v0  ;;  %v1423_v43 = vmul.f32 %v1707_v20, %v1421_v35 }
0x135b   :  { %1425 = vrot.lane.b32.xlu0 %v1423_v43, %s1799_s16 }
0x1366   :  { %v1715_v42 = vpop.eup %1714 }
0x1367   :  { %v1350_v29 = vsub.f32 %v1220_v46, %v1715_v42 }
0x1369   :  { %1352 = vrot.lane.b32.xlu1 %v1350_v29, %s1799_s16 }
0x13cd   :  { %v1426_v6 = vpop.permute.xlu0 %1425 }
0x13ce   :  { %v1428_v40 = vadd.f32 %v1709_v36, %v1426_v6 }
0x13db   :  { %v1353_v25 = vpop.permute.xlu1 %1352 }
0x13dc   :  { %v1355_v2 = vmul.f32 %v1713_v53, %v1353_v25 }
0x13de   :  { %1357 = vrot.lane.b32.xlu1 %v1355_v2, %s1799_s16 }
0x1450   :  { %v1358_v18 = vpop.permute.xlu1 %1357 }
0x1451   :  { %v1360_v37 = vadd.f32 %v1715_v42, %v1358_v18 }
0x1453   :  { %1430 = vrot.lane.b32.xlu1 %v1360_v37, %s1799_s16 }
0x14c5   :  { %v1431_v4 = vpop.permute.xlu1 %1430 }
0x14c6   :  { %v1433_v51 = vsel %vm205_vm1, %v1428_v40, %v1431_v4 }
0x14c7   :  { %v1434_v17 = vpack.c.bf16 %v1433_v51, %v1433_v51 }
0x14c9   :  { %1468 = vmatmul.mubr.bf16.vlgmr.msra.gmra.mxu1 %v1434_v17 }
0x1589   :  { %v1469_v22 = vpop.f32.mrf.mxu1 }
0x158a   :  { %v1476_v1 = vadd.f32 %v1749_v30, %v1469_v22 }
0x158b   :  { %v1471_v23 = vpop.f32.mrf.mxu1 }
0x158c   :  { %v1482_v26 = vadd.f32 %v1748_v34, %v1471_v23  ;;  %v1477_v3 = vsub.f32 0.0, %v1476_v1 }
0x158d   :  { %v1473_v28 = vpop.f32.mrf.mxu1 }
0x158e   :  { %1484 = vrot.lane.b32.xlu0 %v1482_v26, %s1799_s16  ;;  %v1478_v31 = vmul.f32 1.442695, %v1477_v3 }
0x158f   :  { %v1474_v13 = vpop.f32.mrf.mxu1 }
0x1590   :  { %1716 = vpow2.f32 %v1478_v31 }
0x159d   :  { %v1717_v5 = vpop.eup %1716 }
0x159e   :  { %v1480_v27 = vadd.f32 1.0, %v1717_v5 }
0x15a0   :  { %1718 = vrcp.f32 %v1480_v27 }
0x15ad   :  { %v1719_v16 = vpop.eup %1718 }
0x1600   :  { %v1485_v44 = vpop.permute.xlu0 %1484 }
0x1601   :  { %v1487_v46 = vmul.f32 %v1719_v16, %v1485_v44 }
0x1603   :  { %v1488_v47 = vadd.f32 %v1487_v46, %v1482_v26 }
0x1605   :  { %1720 = vtanh.f32 %v1488_v47 }
0x1612   :  { %v1721_v48 = vpop.eup %1720 }
0x1613   :  { %v1490_v50 = vsub.f32 %v1360_v37, %v1721_v48 }
0x1615   :  { %1492 = vrot.lane.b32.xlu1 %v1490_v50, %s1799_s16 }
0x1687   :  { %v1493_v52 = vpop.permute.xlu1 %1492 }
0x1688   :  { %v1495_v54 = vmul.f32 %v1719_v16, %v1493_v52 }
0x168a   :  { %1497 = vrot.lane.b32.xlu0 %v1495_v54, %s1799_s16 }
0x16fc   :  { %v1498_v55 = vpop.permute.xlu0 %1497 }
0x16fd   :  { %v1500_v57 = vadd.f32 %v1721_v48, %v1498_v55 }
0x16ff   :  { %v1501_v58 = vsel %vm205_vm1, %v1500_v57, 0.0 }
0x1700   :  { %v1502_v59 = vrot.slane %v1501_v58, 4 }
0x1702   :  { %v1503_v60 = vadd.f32 %v1502_v59, %v1501_v58 }
0x1704   :  { %v1504_v61 = vrot.slane %v1503_v60, 2 }
0x1706   :  { %v1505_v62 = vadd.f32 %v1504_v61, %v1503_v60 }
0x1708   :  { %v1506_v63 = vrot.slane %v1505_v62, 1 }
0x170a   :  { %v1507_v20 = vadd.f32 %v1506_v63, %v1505_v62 }
0x170c   :  { %v1509_v9 = vmul.f32 0.125, %v1507_v20 }
0x170e   :  { %v1511_v32 = vmul.f32 %v1510_v8, %v1509_v9 }
0x1710   :  { %v1513_v10 = vsel %vm1512_vm3, %v1511_v32, 0.0 }
0x1711   :  { %1514 = vadd.xlane.f32.xlu1 %v1513_v10 }
0x179a   :  { %v1515_v33 = vpop.xlane.xlu1 %1514 }
0x179b   :  { %v1517_v34 = vadd.f32 %v1516_v11, %v1515_v33 }
0x179d   :  { %v1521_v12 = vrot.slane %v1517_v34, %v80_v15 }
0x179f   :  { %1523 = vst.msk [vmem:[%s2370_s10] sm:$0xff] %vm1522_vm4, %v1521_v12 }
0x17a0   :  { %1528 = vsyncpa [#allocation5], 1 }
0x17a1   :  { %1529 = vsyncpa [#allocation7], 1 }

</bundles_post_ra>
